<compile_context>
chip_gen: v5e
topology: v5e:2x2
jax: 0.10.0
libtpu: 0.0.40
codegen_flags: <defaults>
</compile_context>

<pallas_src>
import numpy as np
import jax
import jax.numpy as jnp
from jax.experimental import pallas as pl
from jax.experimental.pallas import tpu as pltpu

_NEG = -1e30  # masks window positions that do not exist for a given filter size


def _round_up(x, m):
    return ((x + m - 1) // m) * m


def _make_kernel(fs_max, p_all, v_pad, n_pad):
    def kernel(idx_ref, tw_ref, mask_ref, bias_ref, out_ref):
        c_pad, tb = idx_ref.shape
        idx = idx_ref[...]                                       # [c_pad, tb] int32
        # One-hot built once (VPU); lane dim = padded vocab (lane-dense).
        iota_v = jax.lax.broadcasted_iota(jnp.int32, (c_pad, tb, v_pad), 2)
        oh = (idx[:, :, None] == iota_v).astype(jnp.float32)     # [c_pad, tb, v_pad]
        # Single MXU matmul: embedding gather + every conv tap of every filter.
        # HIGHEST keeps the f32 gather exact (each output = one tw entry).
        g = jax.lax.dot_general(
            oh, tw_ref[...],
            dimension_numbers=(((2,), (0,)), ((), ())),
            precision=jax.lax.Precision.HIGHEST,
            preferred_element_type=jnp.float32)                  # [c_pad, tb, fs_max*n_pad]
        # Shifted tap sum: major-dim slices (free) + 128-aligned lane slices.
        acc = mask_ref[...]                                      # [p_all, 1, n_pad] (0 / -1e30)
        for s in range(fs_max):
            acc = acc + g[s:s + p_all, :, s * n_pad:(s + 1) * n_pad]
        # Max-pool over positions = element-wise max across major-dim slabs (VPU only).
        pooled = jnp.max(acc, axis=0)                            # [tb, n_pad]
        out_ref[...] = (pooled + bias_ref[...]).astype(out_ref.dtype)
    return kernel


def char_feature_forward(inputs, embed_table, conv_ws, conv_bs,
                         filter_sizes, filter_nums, tile_bt=512):
    bs, max_len, C = inputs.shape
    vocab, D = embed_table.shape
    filter_sizes = [int(f) for f in filter_sizes]
    filter_nums = [int(f) for f in filter_nums]
    fs_min, fs_max = min(filter_sizes), max(filter_sizes)
    assert fs_max <= C, "filter size must not exceed max_len_char"
    p_all = C - fs_min + 1                      # widest valid-position range (smallest filter)
    c_pad = C + (fs_max - fs_min)               # pad char axis so every tap index is in range
    fn_total = int(sum(filter_nums))
    n_pad = _round_up(fn_total, 128)            # lane-dense packed output width
    v_pad = _round_up(vocab, 128)               # lane-dense one-hot / aligned MXU K
    F = fs_max * n_pad                          # all taps side by side

    BT = bs * max_len
    # Keep in-kernel one-hot + tap-matmul intermediates around <= ~6 MiB.
    per_row_bytes = 4 * c_pad * (v_pad + F)
    budget_rows = max(128, (6 * 1024 * 1024) // max(per_row_bytes, 1))
    tile_bt = int(min(int(tile_bt), budget_rows))
    if BT <= tile_bt:
        tile_bt = max(8, _round_up(BT, 8))      # single block (full-dim rule)
    else:
        tile_bt = max(128, (tile_bt // 128) * 128)  # lane dim of the id block when tiled
    BT_pad = _round_up(BT, tile_bt)

    # Only int32 ids go to the kernel; pad with -1 (never matches a vocab id).
    # Transposed so chars are the major dim and words are the lane dim.
    idx = inputs.reshape(BT, C).astype(jnp.int32)
    idx = jnp.pad(idx, ((0, BT_pad - BT), (0, c_pad - C)), constant_values=-1)
    idx_t = idx.T                               # [c_pad, BT_pad]

    # Host-side (tiny) prefold: tw[v, s*n_pad+off_i+f] = embed_table[v] . W_i[s,:,f]
    # (zero for taps s >= fs_i and padded vocab rows), all filters/taps packed
    # into one lane-dense block.
    tw = jnp.zeros((v_pad, F), jnp.float32)
    mask = np.zeros((p_all, 1, n_pad), np.float32)
    bias = np.zeros((1, n_pad), np.float32)
    off = 0
    for fs, Fn, w, b in zip(filter_sizes, filter_nums, conv_ws, conv_bs):
        for s in range(fs):
            blk = jnp.einsum('vd,dn->vn',
                             embed_table.astype(jnp.float32),
                             w[s].astype(jnp.float32), precision='highest')
            tw = tw.at[:vocab, s * n_pad + off: s * n_pad + off + Fn].set(blk)
        P_i = C - fs + 1
        mask[P_i:, 0, off:off + Fn] = _NEG      # mask positions this filter can't reach
        bias[0, off:off + Fn] = np.asarray(b, np.float32)
        off += Fn
    mask = jnp.asarray(mask)
    bias = jnp.asarray(bias)

    kernel = _make_kernel(fs_max, p_all, v_pad, n_pad)
    grid = (BT_pad // tile_bt,)
    flops = int(2 * BT_pad * c_pad * v_pad * F)
    bytes_accessed = int(idx_t.size * 4 + tw.size * 4 + mask.size * 4
                         + bias.size * 4 + BT_pad * n_pad * 4)

    out = pl.pallas_call(
        kernel,
        out_shape=jax.ShapeDtypeStruct((BT_pad, n_pad), jnp.float32),
        grid=grid,
        in_specs=[
            pl.BlockSpec((c_pad, tile_bt), lambda i: (0, i)),    # char ids (transposed, tiled)
            pl.BlockSpec((v_pad, F), lambda i: (0, 0)),          # fused embed*conv weights (resident)
            pl.BlockSpec((p_all, 1, n_pad), lambda i: (0, 0, 0)),  # position validity mask
            pl.BlockSpec((1, n_pad), lambda i: (0, 0)),          # packed bias
        ],
        out_specs=pl.BlockSpec((tile_bt, n_pad), lambda i: (i, 0)),  # lane-dense output
        compiler_params=pltpu.CompilerParams(
            dimension_semantics=("parallel",),
            vmem_limit_bytes=32 * 1024 * 1024),
        cost_estimate=pl.CostEstimate(flops=flops, transcendentals=0,
                                      bytes_accessed=bytes_accessed),
    )(idx_t, tw, mask, bias)

    return out[:BT, :fn_total].reshape(bs, max_len, fn_total)


def char_feature_reference(inputs, embed_table, conv_ws, conv_bs,
                           filter_sizes, filter_nums):
    """Pure-JAX reference mirroring the PyTorch forward."""
    bs, max_len, C = inputs.shape
    D = embed_table.shape[1]
    emb = jnp.take(embed_table, inputs.reshape(-1), axis=0)
    emb = emb.reshape(bs * max_len, C, D).astype(jnp.float32)
    outs = []
    for fs, Fn, w, b in zip(filter_sizes, filter_nums, conv_ws, conv_bs):
        P = C - fs + 1
        conv = jnp.zeros((bs * max_len, P, Fn), jnp.float32)
        for s in range(fs):
            conv = conv + jnp.einsum('bpd,dn->bpn', emb[:, s:s + P, :], w[s],
                                     precision='highest')
        conv = conv + b
        outs.append(jnp.max(conv, axis=1))
    return jnp.concatenate(outs, axis=-1).reshape(bs, max_len, int(sum(filter_nums)))


if __name__ == "__main__":
    # module config (small, consistent with the forward pass)
    feature_size = 64          # char vocab size
    feature_dim = 32           # char embedding dim
    filter_sizes = [2, 3]
    filter_nums = [8, 16]
    bs, max_len, max_len_char = 2, 6, 8

    key = jax.random.PRNGKey(0)
    k_emb, k_idx, kw0, kb0, kw1, kb1 = jax.random.split(key, 6)
    k_ws = [kw0, kw1]
    k_bs = [kb0, kb1]

    # init_embedding-style uniform init
    scale = float(np.sqrt(3.0 / feature_dim))
    embed_table = jax.random.uniform(
        k_emb, (feature_size, feature_dim), jnp.float32, -scale, scale)

    # Conv3d weights: PyTorch shape [Fn, 1, 1, fs, D] stored here as [fs, D, Fn]
    conv_ws, conv_bs = [], []
    for i, (fs, Fn) in enumerate(zip(filter_sizes, filter_nums)):
        fan_in = fs * feature_dim
        bound = 1.0 / float(np.sqrt(fan_in))
        conv_ws.append(jax.random.uniform(
            k_ws[i], (fs, feature_dim, Fn), jnp.float32, -bound, bound))
        conv_bs.append(jax.random.uniform(
            k_bs[i], (Fn,), jnp.float32, -bound, bound))

    inputs = jax.random.randint(
        k_idx, (bs, max_len, max_len_char), 0, feature_size, dtype=jnp.int32)

    out = char_feature_forward(inputs, embed_table, conv_ws, conv_bs,
                               filter_sizes, filter_nums)
    out = jax.block_until_ready(out)

    ref = char_feature_reference(inputs, embed_table, conv_ws, conv_bs,
                                 filter_sizes, filter_nums)
    assert out.shape == (bs, max_len, int(sum(filter_nums)))
    np.testing.assert_allclose(np.asarray(out), np.asarray(ref),
                               rtol=1e-4, atol=1e-4)
    print("KERNEL_OK")
</pallas_src>

<mosaic_0001>
module attributes {stable_mosaic.version = 11 : i64} {
  func.func @kernel(%arg0: i32, %arg1: memref<9x16xi32, #tpu.memory_space<vmem>>, %arg2: memref<128x384xf32, #tpu.memory_space<vmem>>, %arg3: memref<7x1x128xf32, #tpu.memory_space<vmem>>, %arg4: memref<1x128xf32, #tpu.memory_space<vmem>>, %arg5: memref<16x128xf32, #tpu.memory_space<vmem>>) attributes {dimension_semantics = [#tpu.dimension_semantics<parallel>], iteration_bounds = array<i64: 1>, scalar_prefetch = 0 : i64, scratch_operands = 0 : i64, tpu.core_type = #tpu.core_type<tc>, window_params = [{transform_indices = @transform_0, window_bounds = array<i64: 9, 16>}, {pipeline_mode = #tpu.pipeline_mode<synchronous>, transform_indices = @transform_1, window_bounds = array<i64: 128, 384>}, {pipeline_mode = #tpu.pipeline_mode<synchronous>, transform_indices = @transform_2, window_bounds = array<i64: 7, 1, 128>}, {pipeline_mode = #tpu.pipeline_mode<synchronous>, transform_indices = @transform_3, window_bounds = array<i64: 1, 128>}, {transform_indices = @transform_4, window_bounds = array<i64: 16, 128>}]} {
    %c0 = arith.constant 0 : index
    %c0_0 = arith.constant 0 : index
    %0 = vector.load %arg1[%c0, %c0_0] : memref<9x16xi32, #tpu.memory_space<vmem>>, vector<9x16xi32>
    %1 = tpu.iota {dimensions = array<i32: 2>} : vector<9x16x128xi32>
    %2 = vector.shape_cast %0 : vector<9x16xi32> to vector<9x16x1xi32>
    %3 = vector.broadcast %2 : vector<9x16x1xi32> to vector<9x16x128xi32>
    %4 = arith.cmpi eq, %3, %1 : vector<9x16x128xi32>
    %5 = arith.extui %4 : vector<9x16x128xi1> to vector<9x16x128xi32>
    %6 = arith.sitofp %5 : vector<9x16x128xi32> to vector<9x16x128xf32>
    %c0_1 = arith.constant 0 : index
    %c0_2 = arith.constant 0 : index
    %7 = vector.load %arg2[%c0_1, %c0_2] : memref<128x384xf32, #tpu.memory_space<vmem>>, vector<128x384xf32>
    %cst = arith.constant dense<0.000000e+00> : vector<9x16x384xf32>
    %8 = tpu.matmul %6, %7, %cst {dimension_numbers = #tpu.dot_dimension_numbers<[2], [0], [0, 1], [1], [0, 0, 0, 1, 1, 1], [], []>, precision = #tpu.contract_precision<fp32>} : vector<9x16x128xf32>, vector<128x384xf32>, vector<9x16x384xf32> -> vector<9x16x384xf32>
    %c0_3 = arith.constant 0 : index
    %c0_4 = arith.constant 0 : index
    %c0_5 = arith.constant 0 : index
    %9 = vector.load %arg3[%c0_3, %c0_4, %c0_5] : memref<7x1x128xf32, #tpu.memory_space<vmem>>, vector<7x1x128xf32>
    %10 = vector.extract_strided_slice %8 {offsets = [0, 0, 0], sizes = [7, 16, 128], strides = [1, 1, 1]} : vector<9x16x384xf32> to vector<7x16x128xf32>
    %11 = vector.broadcast %9 : vector<7x1x128xf32> to vector<7x16x128xf32>
    %12 = arith.addf %11, %10 : vector<7x16x128xf32>
    %13 = vector.extract_strided_slice %8 {offsets = [1, 0, 128], sizes = [7, 16, 128], strides = [1, 1, 1]} : vector<9x16x384xf32> to vector<7x16x128xf32>
    %14 = arith.addf %12, %13 : vector<7x16x128xf32>
    %15 = vector.extract_strided_slice %8 {offsets = [2, 0, 256], sizes = [7, 16, 128], strides = [1, 1, 1]} : vector<9x16x384xf32> to vector<7x16x128xf32>
    %16 = arith.addf %14, %15 : vector<7x16x128xf32>
    %cst_6 = arith.constant dense<0xFF800000> : vector<16x128xf32>
    %17 = vector.multi_reduction <maximumf>, %16, %cst_6 [0] : vector<7x16x128xf32> to vector<16x128xf32>
    %c0_7 = arith.constant 0 : index
    %c0_8 = arith.constant 0 : index
    %18 = vector.load %arg4[%c0_7, %c0_8] : memref<1x128xf32, #tpu.memory_space<vmem>>, vector<1x128xf32>
    %19 = vector.broadcast %18 : vector<1x128xf32> to vector<16x128xf32>
    %20 = arith.addf %17, %19 : vector<16x128xf32>
    %c0_9 = arith.constant 0 : index
    %c0_10 = arith.constant 0 : index
    %21 = vector.load %arg5[%c0_9, %c0_10] : memref<16x128xf32, #tpu.memory_space<vmem>>, vector<16x128xf32>
    tpu.vector_store %arg5[%c0_9, %c0_10], %20 {strides = array<i32>} : memref<16x128xf32, #tpu.memory_space<vmem>>, vector<16x128xf32>,
    return
  }
  func.func @transform_0(%arg0: i32) -> (i32, i32) {
    %c0_i32 = arith.constant 0 : i32
    %c0_i32_0 = arith.constant 0 : i32
    return %c0_i32, %arg0 : i32, i32
  }
  func.func @transform_1(%arg0: i32) -> (i32, i32) {
    %c0_i32 = arith.constant 0 : i32
    %c0_i32_0 = arith.constant 0 : i32
    %c0_i32_1 = arith.constant 0 : i32
    return %c0_i32, %c0_i32_0 : i32, i32
  }
  func.func @transform_2(%arg0: i32) -> (i32, i32, i32) {
    %c0_i32 = arith.constant 0 : i32
    %c0_i32_0 = arith.constant 0 : i32
    %c0_i32_1 = arith.constant 0 : i32
    %c0_i32_2 = arith.constant 0 : i32
    return %c0_i32, %c0_i32_0, %c0_i32_1 : i32, i32, i32
  }
  func.func @transform_3(%arg0: i32) -> (i32, i32) {
    %c0_i32 = arith.constant 0 : i32
    %c0_i32_0 = arith.constant 0 : i32
    %c0_i32_1 = arith.constant 0 : i32
    return %c0_i32, %c0_i32_0 : i32, i32
  }
  func.func @transform_4(%arg0: i32) -> (i32, i32) {
    %c0_i32 = arith.constant 0 : i32
    %c0_i32_0 = arith.constant 0 : i32
    return %arg0, %c0_i32 : i32, i32
  }
}

</mosaic_0001>

<bundles_post_ra>
// kernel: tpu_custom_call.1
= control target key start
LH: loop header
LB: loop body
LE: loop exit
PB: predicated region body
PF: predicated region fallthrough
CT: control target
= control target key end

     0   :  { %9 = vsyncpa [#allocation3], 0  ;;  %s5350_s0 = inlined_call_operand.hbm [shape: s32[9,16], index: 0, kind: input, shape index: {}]   ;;  %s5351_s1 = inlined_call_operand.hbm [shape: f32[128,384], index: 1, kind: input, shape index: {}]   ;;  %s5352_s2 = inlined_call_operand.hbm [shape: f32[7,1,128], index: 2, kind: input, shape index: {}]   ;;  %s5353_s3 = inlined_call_operand.vmem [shape: f32[1,128], index: 3, kind: input, shape index: {}]   ;;  %s5354_s4 = inlined_call_operand.hbm [shape: f32[16,128], index: 4, kind: output, shape index: {}]  }
   0x1   :  { %10 = vsyncpa [#allocation6], 0  ;;  %s29_s17 = sshll.u32 %s5351_s1, 4  ;;  %s30_s17 = int_to_ptr.hbm [resolvable:$true] %s29_s17 }
   0x2   :  { %11 = vsyncpa [#allocation4], 0  ;;  %s3282_s18 = smov [#allocation5]   ;;  %s16_s22 = sshll.u32 %s5350_s0, 4  ;;  %s17_s22 = int_to_ptr.hbm [resolvable:$true] %s16_s22 }
   0x3   :  { %s31_s19 = sshll.u32 %s3282_s18, 4  ;;  %s3283_s23 = smov 384   ;;  %s32_s19 = int_to_ptr.vmem [resolvable:$true] %s31_s19 }
   0x4   :  { %s3284_s24 = smov 24   ;;  %s3285_s25 = smov [#allocation2]  }
   0x5   :  { %37 = dma.hbm_to_vmem [thread:$0]  %s30_s17, 6144, %s32_s19, [#allocation6], %s3283_s23, %s3283_s23, %s3284_s24  }
   0x6   :  { %s18_s26 = sshll.u32 %s3285_s25, 4  ;;  %s3286_s27 = smov 128   ;;  %s19_s26 = int_to_ptr.vmem [resolvable:$true] %s18_s26 }
   0x7   :  { %s3287_s28 = smov 8   ;;  %s42_s30 = sshll.u32 %s5352_s2, 4  ;;  %s43_s30 = int_to_ptr.hbm [resolvable:$true] %s42_s30 }
   0x8   :  { %24 = dma.hbm_to_vmem [thread:$0]  %s17_s22, 256, %s19_s26, [#allocation3], %s3286_s27, %s3286_s27, %s3287_s28  }
   0x9   :  { %s3288_s5 = smov [#allocation7]   ;;  %s3289_s6 = smov 16  }
   0xa   :  { %s44_s0 = sshll.u32 %s3288_s5, 4  ;;  %s3290_s7 = smov 1   ;;  %s45_s0 = int_to_ptr.vmem [resolvable:$true] %s44_s0 }
   0xb   :  { %50 = dma.hbm_to_vmem [thread:$0]  %s43_s30, 112, %s45_s0, [#allocation6], %s3289_s6, %s3289_s6, %s3290_s7  }
   0xc   :  { %3276 = dma.done.wait [#allocation3], 256  }
   0xd   :  { %3277 = vsyncadd [#allocation3], 4294967040 }
   0xe   :  { %3278 = dma.done.wait [#allocation6], 6256  }
   0xf   :  { %3279 = vsyncadd [#allocation6], 4294961040  ;;  %v67_v0 = vlaneseq  ;;  %v3340_v3 = vld [vmem:[#allocation2] sm:$0xff]  ;;  %v285_v10 = vld [vmem:[#allocation5 + $0x168] sm:$0xff]  ;;  %s3293_s9 = smov [#allocation8]   ;;  %s2916_s13 = sshll.u32 %s5354_s4, 4  ;;  %s2917_s13 = int_to_ptr.hbm [resolvable:$true] %s2916_s13 }
  0x10   :  { %v69_v4 = vperm.slane %v3340_v3, 0  ;;  %v121_v5 = vperm.slane %v3340_v3, 4  ;;  %v134_v6 = vperm.slane %v3340_v3, 5  ;;  %v147_v7 = vperm.slane %v3340_v3, 6  ;;  %v282_v12 = vld [vmem:[#allocation5 + $0x150] sm:$0xff]  ;;  %v279_v17 = vld [vmem:[#allocation5 + $0x138] sm:$0xff] }
  0x11   :  { %v3332_v1 = vshrl.u32 %v67_v0, 7  ;;  %v82_v8 = vperm.slane %v3340_v3, 1  ;;  %v160_v9 = vperm.slane %v3340_v3, 7  ;;  %v3358_v11 = vand.u32 4294901760, %v285_v10  ;;  %v3367_v15 = vld [vmem:[#allocation2 + $0x8] ss:$0 sm:$0xff] }
  0x12   :  { %v3363_v14 = vand.u32 4294901760, %v282_v12  ;;  %v95_v16 = vperm.slane %v3340_v3, 2  ;;  %v3374_v20 = vand.u32 4294901760, %v279_v17  ;;  %v276_v21 = vld [vmem:[#allocation5 + $0x120] sm:$0xff]  ;;  %v273_v26 = vld [vmem:[#allocation5 + $0x108] sm:$0xff]  ;;  %v270_v32 = vld [vmem:[#allocation5 + $0xf0] sm:$0xff] }
  0x13   :  { %3156 = vset.pattern.permute.xlu1 %v3332_v1  ;;  %v3336_v2 = vadd.s32 8, %v3332_v1  ;;  %v3361_v13 = vsub.f32 %v285_v10, %v3358_v11  ;;  %289 = vmatpush.msra.mxu0 %v3358_v11  ;;  %v3386_v25 = vand.u32 4294901760, %v276_v21  ;;  %v3402_v31 = vand.u32 4294901760, %v273_v26  ;;  %v267_v38 = vld [vmem:[#allocation5 + $0xd8] sm:$0xff]  ;;  %v264_v44 = vld [vmem:[#allocation5 + $0xc0] sm:$0xff]  ;;  %v261_v45 = vld [vmem:[#allocation5 + $0xa8] sm:$0xff] }
  0x14   :  { %3110 = vmatpush.msra.mxu2 %v3358_v11  ;;  %v3372_v19 = vsub.f32 %v282_v12, %v3363_v14  ;;  %v3384_v24 = vsub.f32 %v279_v17, %v3374_v20  ;;  %v3408_v36 = vand.u32 4294901760, %v270_v32  ;;  %v3421_v42 = vand.u32 4294901760, %v267_v38  ;;  %v258_v46 = vld [vmem:[#allocation5 + $0x90] sm:$0xff]  ;;  %v255_v51 = vld [vmem:[#allocation5 + $0x78] sm:$0xff]  ;;  %v252_v52 = vld [vmem:[#allocation5 + $0x60] sm:$0xff]  ;;  %s2914_s10 = sshll.u32 %s3293_s9, 4  ;;  %s2915_s10 = int_to_ptr.vmem [resolvable:$true] %s2914_s10 }
  0x15   :  { %3154 = vset.pattern.permute.xlu0 %v3336_v2  ;;  %3158 = vset.pattern.permute.xlu2 %v3336_v2  ;;  %v463_v18 = vand.u32 4294901760, %v3361_v13  ;;  %v3398_v30 = vsub.f32 %v276_v21, %v3386_v25  ;;  %v3411_v37 = vsub.f32 %v273_v26, %v3402_v31  ;;  %v3429_v50 = vand.u32 4294901760, %v264_v44  ;;  %v249_v61 = vld [vmem:[#allocation5 + $0x48] sm:$0xff]  ;;  %v243_v17 = vld [vmem:[#allocation5 + $0x18] sm:$0xff] }
  0x16   :  { %291 = vmatpush.msra.mxu0 %v3363_v14  ;;  %3111 = vmatpush.msra.mxu2 %v3363_v14  ;;  %v469_v23 = vand.u32 4294901760, %v3372_v19  ;;  %v475_v29 = vand.u32 4294901760, %v3384_v24  ;;  %v3419_v41 = vsub.f32 %v270_v32, %v3408_v36  ;;  %v3427_v49 = vsub.f32 %v267_v38, %v3421_v42 }
  0x17   :  { %v464_v22 = vsub.f32 %v3361_v13, %v463_v18  ;;  %v481_v35 = vand.u32 4294901760, %v3398_v30  ;;  %v487_v43 = vand.u32 4294901760, %v3411_v37  ;;  %v3435_v54 = vand.u32 4294901760, %v261_v45 }
  0x18   :  { %293 = vmatpush.msra.mxu0 %v3374_v20  ;;  %3112 = vmatpush.msra.mxu2 %v3374_v20  ;;  %v470_v28 = vsub.f32 %v3372_v19, %v469_v23  ;;  %v476_v34 = vsub.f32 %v3384_v24, %v475_v29  ;;  %v493_v48 = vand.u32 4294901760, %v3419_v41  ;;  %v3437_v55 = vand.u32 4294901760, %v258_v46 }
  0x19   :  { %v465_v27 = vand.u32 4294901760, %v464_v22  ;;  %v482_v40 = vsub.f32 %v3398_v30, %v481_v35  ;;  %v488_v53 = vsub.f32 %v3411_v37, %v487_v43  ;;  %v3439_v56 = vand.u32 4294901760, %v255_v51 }
  0x1a   :  { %295 = vmatpush.msra.mxu0 %v3386_v25  ;;  %3113 = vmatpush.msra.mxu2 %v3386_v25  ;;  %v471_v33 = vand.u32 4294901760, %v470_v28  ;;  %v477_v39 = vand.u32 4294901760, %v476_v34  ;;  %v494_v57 = vsub.f32 %v3419_v41, %v493_v48  ;;  %v499_v58 = vand.u32 4294901760, %v3427_v49 }
  0x1b   :  { %74 = vperm.xlu1 %3156, %v69_v4   ;;  %466 = vmatpush.msra.mxu1 %v465_v27  ;;  %v483_v47 = vand.u32 4294901760, %v482_v40  ;;  %v3447_v59 = vsub.f32 %v264_v44, %v3429_v50  ;;  %v3449_v60 = vand.u32 4294901760, %v252_v52  ;;  %v489_v62 = vand.u32 4294901760, %v488_v53 }
  0x1c   :  { %3126 = vmatpush.msra.mxu3 %v465_v27  ;;  %297 = vmatpush.msra.mxu0 %v3402_v31  ;;  %v3452_v63 = vsub.f32 %v261_v45, %v3435_v54  ;;  %v3473_v27 = vand.u32 4294901760, %v249_v61  ;;  %v3490_v40 = vand.u32 4294901760, %v243_v17 }
  0x1d   :  { %132 = vperm.xlu0 %3154, %v121_v5   ;;  %80 = vperm.xlu2 %3158, %v69_v4   ;;  %v3455_v4 = vsub.f32 %v258_v46, %v3437_v55  ;;  %v505_v10 = vand.u32 4294901760, %v3447_v59  ;;  %v3467_v12 = vsub.f32 %v252_v52, %v3449_v60 }
  0x1e   :  { %3114 = vmatpush.msra.mxu2 %v3402_v31  ;;  %472 = vmatpush.msra.mxu1 %v471_v33  ;;  %v511_v21 = vand.u32 4294901760, %v3452_v63  ;;  %v3493_v45 = vsub.f32 %v249_v61, %v3473_v27  ;;  %v3505_v52 = vsub.f32 %v243_v17, %v3490_v40 }
  0x1f   :  { %3127 = vmatpush.msra.mxu3 %v471_v33  ;;  %299 = vmatpush.msra.mxu0 %v3408_v36  ;;  %v517_v22 = vand.u32 4294901760, %v3455_v4  ;;  %v506_v32 = vsub.f32 %v3447_v59, %v505_v10 }
  0x20   :  { %478 = vmatpush.msra.mxu1 %v477_v39  ;;  %3115 = vmatpush.msra.mxu2 %v3408_v36  ;;  %v512_v34 = vsub.f32 %v3452_v63, %v511_v21  ;;  %v535_v53 = vand.u32 4294901760, %v3493_v45 }
  0x21   :  { %3128 = vmatpush.msra.mxu3 %v477_v39  ;;  %301 = vmatpush.msra.mxu0 %v3421_v42  ;;  %v518_v38 = vsub.f32 %v3455_v4, %v517_v22  ;;  %v529_v39 = vand.u32 4294901760, %v3467_v12  ;;  %v507_v44 = vand.u32 4294901760, %v506_v32  ;;  %v240_v32 = vld [vmem:[#allocation5] sm:$0xff] }
  0x22   :  { %484 = vmatpush.msra.mxu1 %v483_v47  ;;  %3116 = vmatpush.msra.mxu2 %v3421_v42 }
  0x23   :  { %3157 = vset.pattern.permute.xlu1 %v3336_v2  ;;  %3129 = vmatpush.msra.mxu3 %v483_v47  ;;  %v513_v47 = vand.u32 4294901760, %v512_v34  ;;  %v519_v61 = vand.u32 4294901760, %v518_v38  ;;  %v3525_v34 = vand.u32 4294901760, %v240_v32 }
  0x24   :  { %303 = vmatpush.msra.mxu0 %v3429_v50  ;;  %490 = vmatpush.msra.mxu1 %v489_v62 }
  0x25   :  { %3155 = vset.pattern.permute.xlu0 %v3332_v1  ;;  %3159 = vset.pattern.permute.xlu2 %v3332_v1 }
  0x26   :  { %3130 = vmatpush.msra.mxu3 %v489_v62  ;;  %305 = vmatpush.msra.mxu0 %v3435_v54 }
  0x27   :  { %3117 = vmatpush.msra.mxu2 %v3429_v50 }
  0x28   :  { %307 = vmatpush.msra.mxu0 %v3437_v55 }
  0x29   :  { %3118 = vmatpush.msra.mxu2 %v3435_v54 }
  0x2a   :  { %309 = vmatpush.msra.mxu0 %v3439_v56 }
  0x2b   :  { %145 = vperm.xlu1 %3157, %v134_v6   ;;  %3119 = vmatpush.msra.mxu2 %v3437_v55 }
  0x2c   :  { %311 = vmatpush.msra.mxu0 %v3449_v60 }
  0x2d   :  { %139 = vperm.xlu0 %3155, %v134_v6   ;;  %152 = vperm.xlu2 %3159, %v147_v7   ;;  %v3458_v6 = vsub.f32 %v255_v51, %v3439_v56 }
  0x2e   :  { %313 = vmatpush.msra.mxu0 %v3473_v27  ;;  %3120 = vmatpush.msra.mxu2 %v3439_v56 }
  0x2f   :  { %v523_v26 = vand.u32 4294901760, %v3458_v6 }
  0x30   :  { %3121 = vmatpush.msra.mxu2 %v3449_v60 }
  0x31   :  { %v524_v51 = vsub.f32 %v3458_v6, %v523_v26 }
  0x32   :  { %3122 = vmatpush.msra.mxu2 %v3473_v27 }
  0x33   :  { %3160 = vset.pattern.permute.xlu1 %v3332_v1 }
  0x35   :  { %3162 = vset.pattern.permute.xlu0 %v3336_v2  ;;  %3161 = vset.pattern.permute.xlu2 %v3336_v2 }
  0x3b   :  { %87 = vperm.xlu1 %3160, %v82_v8  }
  0x3d   :  { %93 = vperm.xlu0 %3162, %v82_v8   ;;  %158 = vperm.xlu2 %3161, %v147_v7   ;;  %v246_v7 = vld [vmem:[#allocation5 + $0x30] sm:$0xff]  ;;  %v495_v8 = vand.u32 4294901760, %v494_v57  ;;  %v108_v57 = vperm.slane %v3340_v3, 3  ;;  %v5522_v3 = vmov 0 }
  0x3e   :  { %v3480_v33 = vand.u32 4294901760, %v246_v7 }
  0x3f   :  { %496 = vmatpush.msra.mxu1 %v495_v8  ;;  %3131 = vmatpush.msra.mxu3 %v495_v8  ;;  %v536_v8 = vsub.f32 %v3493_v45, %v535_v53 }
  0x40   :  { %v3496_v46 = vsub.f32 %v246_v7, %v3480_v33  ;;  %v525_v7 = vand.u32 4294901760, %v524_v51  ;;  %315 = vmatpush.msra.mxu0 %v3480_v33  ;;  %3123 = vmatpush.msra.mxu2 %v3480_v33 }
  0x41   :  { %v537_v38 = vand.u32 4294901760, %v536_v8 }
  0x42   :  { %v541_v62 = vand.u32 4294901760, %v3496_v46  ;;  %317 = vmatpush.msra.mxu0 %v3490_v40  ;;  %3124 = vmatpush.msra.mxu2 %v3490_v40 }
  0x43   :  { %165 = vperm.xlu1 %3160, %v160_v9  }
  0x44   :  { %319 = vmatpush.msra.mxu0 %v3525_v34  ;;  %3125 = vmatpush.msra.mxu2 %v3525_v34 }
  0x45   :  { %3166 = vset.pattern.permute.xlu0 %v3332_v1  ;;  %3163 = vset.pattern.permute.xlu2 %v3332_v1 }
  0x46   :  { %901 = vmatpush.msrb.mxu0 %v463_v18  ;;  %628 = vmatpush.msrb.mxu2 %v3361_v13 }
  0x48   :  { %905 = vmatpush.msrb.mxu0 %v469_v23  ;;  %631 = vmatpush.msrb.mxu2 %v3372_v19 }
  0x4a   :  { %909 = vmatpush.msrb.mxu0 %v475_v29  ;;  %634 = vmatpush.msrb.mxu2 %v3384_v24 }
  0x4b   :  { %3164 = vset.pattern.permute.xlu1 %v3336_v2 }
  0x4c   :  { %913 = vmatpush.msrb.mxu0 %v481_v35  ;;  %637 = vmatpush.msrb.mxu2 %v3398_v30 }
  0x4d   :  { %178 = vperm.xlu0 %3166, %v3367_v15   ;;  %100 = vperm.xlu2 %3163, %v95_v16  }
  0x4e   :  { %917 = vmatpush.msrb.mxu0 %v487_v43  ;;  %640 = vmatpush.msrb.mxu2 %v3411_v37 }
  0x50   :  { %921 = vmatpush.msrb.mxu0 %v493_v48  ;;  %643 = vmatpush.msrb.mxu2 %v3419_v41 }
  0x52   :  { %925 = vmatpush.msrb.mxu0 %v499_v58  ;;  %646 = vmatpush.msrb.mxu2 %v3427_v49 }
  0x53   :  { %171 = vperm.xlu1 %3164, %v160_v9   ;;  %v500_v9 = vsub.f32 %v3427_v49, %v499_v58  ;;  %v5538_v49 = vmov 0 }
  0x54   :  { %929 = vmatpush.msrb.mxu0 %v505_v10  ;;  %649 = vmatpush.msrb.mxu2 %v3447_v59 }
  0x55   :  { %3165 = vset.pattern.permute.xlu2 %v3336_v2  ;;  %3170 = vset.pattern.permute.xlu0 %v3336_v2  ;;  %v501_v28 = vand.u32 4294901760, %v500_v9  ;;  %v547_v9 = vand.u32 4294901760, %v3505_v52 }
  0x56   :  { %933 = vmatpush.msrb.mxu0 %v511_v21  ;;  %652 = vmatpush.msrb.mxu2 %v3452_v63 }
  0x57   :  { %502 = vmatpush.msra.mxu1 %v501_v28  ;;  %3132 = vmatpush.msra.mxu3 %v501_v28  ;;  %v542_v28 = vsub.f32 %v3496_v46, %v541_v62 }
  0x58   :  { %937 = vmatpush.msrb.mxu0 %v517_v22  ;;  %655 = vmatpush.msrb.mxu2 %v3455_v4 }
  0x59   :  { %508 = vmatpush.msra.mxu1 %v507_v44  ;;  %3133 = vmatpush.msra.mxu3 %v507_v44  ;;  %v548_v44 = vsub.f32 %v3505_v52, %v547_v9  ;;  %v543_v51 = vand.u32 4294901760, %v542_v28 }
  0x5a   :  { %941 = vmatpush.msrb.mxu0 %v523_v26  ;;  %658 = vmatpush.msrb.mxu2 %v3458_v6  ;;  %v5548_v6 = vmov 0 }
  0x5b   :  { %3167 = vset.pattern.permute.xlu1 %v3332_v1  ;;  %514 = vmatpush.msra.mxu1 %v513_v47 }
  0x5c   :  { %3134 = vmatpush.msra.mxu3 %v513_v47  ;;  %v3533_v47 = vsub.f32 %v240_v32, %v3525_v34  ;;  %945 = vmatpush.msrb.mxu0 %v529_v39 }
  0x5d   :  { %106 = vperm.xlu2 %3165, %v95_v16   ;;  %v530_v16 = vsub.f32 %v3467_v12, %v529_v39  ;;  %520 = vmatpush.msra.mxu1 %v519_v61 }
  0x5e   :  { %3135 = vmatpush.msra.mxu3 %v519_v61  ;;  %v553_v61 = vand.u32 4294901760, %v3533_v47  ;;  %661 = vmatpush.msrb.mxu2 %v3467_v12 }
  0x5f   :  { %v531_v17 = vand.u32 4294901760, %v530_v16  ;;  %526 = vmatpush.msra.mxu1 %v525_v7  ;;  %949 = vmatpush.msrb.mxu0 %v535_v53 }
  0x60   :  { %3136 = vmatpush.msra.mxu3 %v525_v7  ;;  %v554_v16 = vsub.f32 %v3533_v47, %v553_v61  ;;  %664 = vmatpush.msrb.mxu2 %v3493_v45  ;;  %v5557_v45 = vmov 0 }
  0x61   :  { %532 = vmatpush.msra.mxu1 %v531_v17  ;;  %953 = vmatpush.msrb.mxu0 %v541_v62  ;;  %v5560_v62 = vmov 0 }
  0x62   :  { %3137 = vmatpush.msra.mxu3 %v531_v17  ;;  %v555_v7 = vand.u32 4294901760, %v554_v16  ;;  %667 = vmatpush.msrb.mxu2 %v3496_v46 }
  0x63   :  { %113 = vperm.xlu1 %3167, %v108_v57   ;;  %538 = vmatpush.msra.mxu1 %v537_v38 }
  0x64   :  { %3138 = vmatpush.msra.mxu3 %v537_v38  ;;  %957 = vmatpush.msrb.mxu0 %v547_v9 }
  0x65   :  { %184 = vperm.xlu2 %3165, %v3367_v15   ;;  %v549_v15 = vand.u32 4294901760, %v548_v44  ;;  %544 = vmatpush.msra.mxu1 %v543_v51 }
  0x66   :  { %3139 = vmatpush.msra.mxu3 %v543_v51  ;;  %670 = vmatpush.msrb.mxu2 %v3505_v52 }
  0x67   :  { %550 = vmatpush.msra.mxu1 %v549_v15  ;;  %961 = vmatpush.msrb.mxu0 %v553_v61 }
  0x68   :  { %3140 = vmatpush.msra.mxu3 %v549_v15  ;;  %673 = vmatpush.msrb.mxu2 %v3533_v47 }
  0x69   :  { %556 = vmatpush.msra.mxu1 %v555_v7 }
  0x6a   :  { %3141 = vmatpush.msra.mxu3 %v555_v7  ;;  %v5571_v7 = vmov 0 }
  0x6b   :  { %3168 = vset.pattern.permute.xlu1 %v3336_v2  ;;  %1032 = vmatpush.msrb.mxu1 %v3358_v11  ;;  %v3613_v2 = vand.u32 127, %v67_v0 }
  0x6c   :  { %762 = vmatpush.msrb.mxu3 %v3358_v11  ;;  %v5361_v11 = vmov 1.0  }
  0x6d   :  { %3169 = vset.pattern.permute.xlu2 %v3332_v1  ;;  %1034 = vmatpush.msrb.mxu1 %v3363_v14 }
  0x6e   :  { %764 = vmatpush.msrb.mxu3 %v3363_v14  ;;  %v5359_v14 = vmov 0.0  }
  0x6f   :  { %1036 = vmatpush.msrb.mxu1 %v3374_v20 }
  0x70   :  { %766 = vmatpush.msrb.mxu3 %v3374_v20  ;;  %v5527_v20 = vmov 0 }
  0x71   :  { %1038 = vmatpush.msrb.mxu1 %v3386_v25 }
  0x72   :  { %768 = vmatpush.msrb.mxu3 %v3386_v25 }
  0x73   :  { %119 = vperm.xlu1 %3168, %v108_v57   ;;  %1040 = vmatpush.msrb.mxu1 %v3402_v31 }
  0x74   :  { %770 = vmatpush.msrb.mxu3 %v3402_v31 }
  0x75   :  { %126 = vperm.xlu2 %3169, %v121_v5   ;;  %1042 = vmatpush.msrb.mxu1 %v3408_v36  ;;  %v5525_v5 = vmov 0 }
  0x76   :  { %772 = vmatpush.msrb.mxu3 %v3408_v36 }
  0x77   :  { %1044 = vmatpush.msrb.mxu1 %v3421_v42  ;;  %v81_v1 = vpop.permute.xlu2 %80 }
  0x78   :  { %774 = vmatpush.msrb.mxu3 %v3421_v42  ;;  %vm3621_vm0 = vcmp.eq.s32.totalorder %v81_v1, %v3613_v2 }
  0x79   :  { %1046 = vmatpush.msrb.mxu1 %v3429_v50  ;;  %v5523_v3 = vsel %vm3621_vm0, 4294967295, %v5522_v3  ;;  %v2931_v19 = vsel %vm3621_vm0, 1.0, %v5359_v14 }
  0x7a   :  { %776 = vmatpush.msrb.mxu3 %v3429_v50  ;;  %5524 = vst [vmem:[#allocation12_spill] sm:$0xff] %v5523_v3  ;;  %v3669_v30 = vsub.f32 %v2931_v19, %v2931_v19 }
  0x7b   :  { %1048 = vmatpush.msrb.mxu1 %v3435_v54 }
  0x7c   :  { %778 = vmatpush.msrb.mxu3 %v3435_v54  ;;  %5533 = vst [vmem:[#allocation17_spill] sm:$0xff] %v3669_v30  ;;  %v3684_v41 = vand.u32 4294901760, %v3669_v30 }
  0x7d   :  { %1050 = vmatpush.msrb.mxu1 %v3437_v55 }
  0x7e   :  { %780 = vmatpush.msrb.mxu3 %v3437_v55  ;;  %5536 = vst [vmem:[#allocation20_spill] sm:$0xff] %v3684_v41  ;;  %v331_v43 = vsub.f32 %v3669_v30, %v3684_v41 }
  0x7f   :  { %1052 = vmatpush.msrb.mxu1 %v3439_v56 }
  0x80   :  { %782 = vmatpush.msrb.mxu3 %v3439_v56  ;;  %v3700_v50 = vand.u32 4294901760, %v331_v43  ;;  %v5542_v56 = vmov 0 }
  0x81   :  { %1054 = vmatpush.msrb.mxu1 %v3449_v60 }
  0x82   :  { %784 = vmatpush.msrb.mxu3 %v3449_v60  ;;  %5541 = vst [vmem:[#allocation23_spill] sm:$0xff] %v3700_v50 }
  0x83   :  { %1056 = vmatpush.msrb.mxu1 %v3473_v27 }
  0x84   :  { %786 = vmatpush.msrb.mxu3 %v3473_v27 }
  0x85   :  { %1058 = vmatpush.msrb.mxu1 %v3480_v33 }
  0x86   :  { %788 = vmatpush.msrb.mxu3 %v3480_v33 }
  0x87   :  { %1060 = vmatpush.msrb.mxu1 %v3490_v40  ;;  %v153_v55 = vpop.permute.xlu2 %152 }
  0x88   :  { %790 = vmatpush.msrb.mxu3 %v3490_v40  ;;  %vm3725_vm5 = vcmp.eq.s32.totalorder %v153_v55, %v3613_v2  ;;  %v5554_v40 = vmov 0 }
  0x89   :  { %1062 = vmatpush.msrb.mxu1 %v3525_v34  ;;  %v5549_v6 = vsel %vm3725_vm5, 4294967295, %v5548_v6  ;;  %v2942_v26 = vsel %vm3725_vm5, 1.0, %v5359_v14 }
  0x8a   :  { %792 = vmatpush.msrb.mxu3 %v3525_v34  ;;  %5550 = vst [vmem:[#allocation28_spill] sm:$0xff] %v5549_v6  ;;  %v3745_v33 = vsub.f32 %v2942_v26, %v2942_v26  ;;  %v5566_v34 = vmov 0 }
  0x8c   :  { %5553 = vst [vmem:[#allocation31_spill] sm:$0xff] %v3745_v33  ;;  %v3773_v9 = vand.u32 4294901760, %v3745_v33 }
  0x8d   :  { %v75_v0 = vpop.permute.xlu1 %74 }
  0x8e   :  { %vm3631_vm1 = vcmp.eq.s32.totalorder %v75_v0, %v3613_v2  ;;  %5564 = vst [vmem:[#allocation36_spill] sm:$0xff] %v3773_v9  ;;  %v419_v47 = vsub.f32 %v3745_v33, %v3773_v9 }
  0x8f   :  { %v5526_v5 = vsel %vm3631_vm1, 4294967295, %v5525_v5  ;;  %2948 = vmatmul.msk.f32.vlgmr.msra.gmra.mxu1 %vm3631_vm1, %v5361_v11  ;;  %v133_v13 = vpop.permute.xlu0 %132  ;;  %v2930_v18 = vsel %vm3631_vm1, 1.0, %v5359_v14 }
  0x90   :  { %vm3649_vm2 = vcmp.eq.s32.totalorder %v133_v13, %v3613_v2  ;;  %v3653_v23 = vsub.f32 %v2930_v18, %v2930_v18  ;;  %v3818_v13 = vand.u32 4294901760, %v419_v47 }
  0x91   :  { %v5528_v20 = vsel %vm3649_vm2, 4294967295, %v5527_v20  ;;  %2957 = vmatmul.msk.f32.vlgmr.msra.gmra.mxu3 %vm3649_vm2, %v5361_v11  ;;  %v2939_v24 = vsel %vm3649_vm2, 1.0, %v5359_v14 }
  0x92   :  { %5529 = vst [vmem:[#allocation13_spill] sm:$0xff] %v5528_v20  ;;  %v3665_v25 = vand.u32 4294901760, %v3653_v23  ;;  %v3667_v29 = vsub.f32 %v2939_v24, %v2939_v24 }
  0x93   :  { %5530 = vst [vmem:[#allocation14_spill] sm:$0xff] %v3653_v23 }
  0x94   :  { %5531 = vst [vmem:[#allocation15_spill] sm:$0xff] %v3665_v25  ;;  %v323_v31 = vsub.f32 %v3653_v23, %v3665_v25  ;;  %v3677_v35 = vand.u32 4294901760, %v3667_v29 }
  0x95   :  { %5532 = vst [vmem:[#allocation16_spill] sm:$0xff] %v3667_v29 }
  0x96   :  { %5534 = vst [vmem:[#allocation18_spill] sm:$0xff] %v3677_v35  ;;  %v3679_v36 = vand.u32 4294901760, %v323_v31  ;;  %v395_v37 = vsub.f32 %v3667_v29, %v3677_v35 }
  0x97   :  { %2949 = vmatmul.msk.f32.gmra.mxu1 %vm3621_vm0, %v5361_v11  ;;  %v159_v12 = vpop.permute.xlu2 %158  ;;  %5575 = vst [vmem:[#allocation43_spill] sm:$0xff] %v3818_v13 }
  0x98   :  { %5535 = vst [vmem:[#allocation19_spill] sm:$0xff] %v3679_v36  ;;  %325 = vmatmul.f32.vlgmr.msra.gmra.mxu0 %v3679_v36  ;;  %v3690_v42 = vand.u32 4294901760, %v395_v37  ;;  %vm3753_vm7 = vcmp.eq.s32.totalorder %v159_v12, %v3613_v2  ;;  %v5578_v37 = vmov 0 }
  0x99   :  { %v5558_v45 = vsel %vm3753_vm7, 4294967295, %v5557_v45  ;;  %v2943_v28 = vsel %vm3753_vm7, 1.0, %v5359_v14 }
  0x9a   :  { %5537 = vst [vmem:[#allocation21_spill] sm:$0xff] %v3690_v42  ;;  %397 = vmatmul.f32.vlgmr.msra.gmra.mxu2 %v3690_v42  ;;  %v3802_v61 = vsub.f32 %v2943_v28, %v2943_v28 }
  0x9c   :  { %v3823_v19 = vand.u32 4294901760, %v3802_v61 }
  0x9d   :  { %v146_v48 = vpop.permute.xlu1 %145 }
  0x9e   :  { %vm3696_vm3 = vcmp.eq.s32.totalorder %v146_v48, %v3613_v2  ;;  %5576 = vst [vmem:[#allocation44_spill] sm:$0xff] %v3823_v19  ;;  %v427_v48 = vsub.f32 %v3802_v61, %v3823_v19 }
  0x9f   :  { %v5539_v49 = vsel %vm3696_vm3, 4294967295, %v5538_v49  ;;  %v140_v54 = vpop.permute.xlu0 %139  ;;  %v2941_v59 = vsel %vm3696_vm3, 1.0, %v5359_v14 }
  0xa0   :  { %5540 = vst [vmem:[#allocation22_spill] sm:$0xff] %v5539_v49  ;;  %vm3703_vm4 = vcmp.eq.s32.totalorder %v140_v54, %v3613_v2  ;;  %333 = vmatmul.f32.gmra.mxu0 %v3700_v50  ;;  %v3722_v4 = vsub.f32 %v2941_v59, %v2941_v59  ;;  %v3855_v59 = vand.u32 4294901760, %v427_v48 }
  0xa1   :  { %v5543_v56 = vsel %vm3703_vm4, 4294967295, %v5542_v56  ;;  %2958 = vmatmul.msk.f32.gmra.mxu3 %vm3703_vm4, %v5361_v11  ;;  %v2940_v58 = vsel %vm3703_vm4, 1.0, %v5359_v14 }
  0xa2   :  { %5544 = vst [vmem:[#allocation24_spill] sm:$0xff] %v5543_v56  ;;  %v3717_v60 = vsub.f32 %v2940_v58, %v2940_v58  ;;  %v3734_v22 = vand.u32 4294901760, %v3722_v4 }
  0xa3   :  { %5547 = vst [vmem:[#allocation27_spill] sm:$0xff] %v3722_v4 }
  0xa4   :  { %5545 = vst [vmem:[#allocation25_spill] sm:$0xff] %v3717_v60  ;;  %v3720_v63 = vand.u32 4294901760, %v3717_v60  ;;  %v411_v27 = vsub.f32 %v3722_v4, %v3734_v22 }
  0xa5   :  { %5552 = vst [vmem:[#allocation30_spill] sm:$0xff] %v3734_v22 }
  0xa6   :  { %5546 = vst [vmem:[#allocation26_spill] sm:$0xff] %v3720_v63  ;;  %v403_v10 = vsub.f32 %v3717_v60, %v3720_v63  ;;  %v3763_v57 = vand.u32 4294901760, %v411_v27 }
  0xa7   :  { %v101_v53 = vpop.permute.xlu2 %100  ;;  %5583 = vst [vmem:[#allocation49_spill] sm:$0xff] %v3855_v59 }
  0xa8   :  { %v3731_v21 = vand.u32 4294901760, %v403_v10  ;;  %5559 = vst [vmem:[#allocation33_spill] sm:$0xff] %v3763_v57  ;;  %vm3789_vm9 = vcmp.eq.s32.totalorder %v101_v53, %v3613_v2 }
  0xa9   :  { %2959 = vmatmul.msk.f32.gmra.mxu3 %vm3696_vm3, %v5361_v11  ;;  %v5567_v34 = vsel %vm3789_vm9, 4294967295, %v5566_v34  ;;  %v2934_v16 = vsel %vm3789_vm9, 1.0, %v5359_v14 }
  0xaa   :  { %5551 = vst [vmem:[#allocation29_spill] sm:$0xff] %v3731_v21  ;;  %405 = vmatmul.f32.gmra.mxu2 %v3731_v21  ;;  %v3825_v24 = vsub.f32 %v2934_v16, %v2934_v16 }
  0xab   :  { %5568 = vst [vmem:[#allocation38_spill] sm:$0xff] %v5567_v34 }
  0xac   :  { %5577 = vst [vmem:[#allocation45_spill] sm:$0xff] %v3825_v24  ;;  %v3844_v54 = vand.u32 4294901760, %v3825_v24 }
  0xad   :  { %v88_v39 = vpop.permute.xlu1 %87 }
  0xae   :  { %vm3748_vm6 = vcmp.eq.s32.totalorder %v88_v39, %v3613_v2  ;;  %5582 = vst [vmem:[#allocation48_spill] sm:$0xff] %v3844_v54  ;;  %v355_v10 = vsub.f32 %v3825_v24, %v3844_v54 }
  0xaf   :  { %v5555_v40 = vsel %vm3748_vm6, 4294967295, %v5554_v40  ;;  %2950 = vmatmul.msk.f32.gmra.mxu1 %vm3748_vm6, %v5361_v11  ;;  %v94_v46 = vpop.permute.xlu0 %93  ;;  %v2932_v52 = vsel %vm3748_vm6, 1.0, %v5359_v14 }
  0xb0   :  { %5556 = vst [vmem:[#allocation32_spill] sm:$0xff] %v5555_v40  ;;  %vm3766_vm8 = vcmp.eq.s32.totalorder %v94_v46, %v3613_v2  ;;  %v3770_v8 = vsub.f32 %v2932_v52, %v2932_v52  ;;  %v3868_v39 = vand.u32 4294901760, %v355_v10  ;;  %v5586_v52 = vmov 0 }
  0xb1   :  { %v5561_v62 = vsel %vm3766_vm8, 4294967295, %v5560_v62  ;;  %2960 = vmatmul.msk.f32.gmra.mxu3 %vm3725_vm5, %v5361_v11  ;;  %v2933_v17 = vsel %vm3766_vm8, 1.0, %v5359_v14 }
  0xb2   :  { %5562 = vst [vmem:[#allocation34_spill] sm:$0xff] %v5561_v62  ;;  %413 = vmatmul.f32.gmra.mxu2 %v3763_v57  ;;  %v3786_v32 = vand.u32 4294901760, %v3770_v8  ;;  %v3793_v38 = vsub.f32 %v2933_v17, %v2933_v17 }
  0xb3   :  { %5563 = vst [vmem:[#allocation35_spill] sm:$0xff] %v3770_v8 }
  0xb4   :  { %5565 = vst [vmem:[#allocation37_spill] sm:$0xff] %v3786_v32  ;;  %v339_v44 = vsub.f32 %v3770_v8, %v3786_v32  ;;  %v3800_v51 = vand.u32 4294901760, %v3793_v38 }
  0xb5   :  { %5569 = vst [vmem:[#allocation39_spill] sm:$0xff] %v3793_v38  ;;  %v166_v15 = vpop.permute.xlu1 %165 }
  0xb6   :  { %5570 = vst [vmem:[#allocation40_spill] sm:$0xff] %v3800_v51  ;;  %vm3808_vm10 = vcmp.eq.s32.totalorder %v166_v15, %v3613_v2  ;;  %v3812_v1 = vand.u32 4294901760, %v339_v44  ;;  %v347_v18 = vsub.f32 %v3793_v38, %v3800_v51 }
  0xb7   :  { %v5572_v7 = vsel %vm3808_vm10, 4294967295, %v5571_v7  ;;  %2951 = vmatmul.msk.f32.gmra.mxu1 %vm3766_vm8, %v5361_v11  ;;  %v107_v0 = vpop.permute.xlu2 %106  ;;  %v2944_v31 = vsel %vm3808_vm10, 1.0, %v5359_v14  ;;  %5585 = vst [vmem:[#allocation51_spill] sm:$0xff] %v3868_v39 }
  0xb8   :  { %5573 = vst [vmem:[#allocation41_spill] sm:$0xff] %v5572_v7  ;;  %341 = vmatmul.f32.gmra.mxu0 %v3812_v1  ;;  %vm3835_vm11 = vcmp.eq.s32.totalorder %v107_v0, %v3613_v2  ;;  %v3839_v43 = vand.u32 4294901760, %v347_v18  ;;  %v3846_v55 = vsub.f32 %v2944_v31, %v2944_v31  ;;  %v5721_v7 = vld [vmem:[#allocation27_spill] sm:$0xff] }
  0xb9   :  { %5574 = vst [vmem:[#allocation42_spill] sm:$0xff] %v3812_v1  ;;  %2961 = vmatmul.msk.f32.gmra.mxu3 %vm3753_vm7, %v5361_v11  ;;  %v5579_v37 = vsel %vm3835_vm11, 4294967295, %v5578_v37  ;;  %v2935_v58 = vsel %vm3835_vm11, 1.0, %v5359_v14 }
  0xba   :  { %421 = vmatmul.f32.gmra.mxu2 %v3818_v13  ;;  %5580 = vst [vmem:[#allocation46_spill] sm:$0xff] %v5579_v37  ;;  %v3860_v12 = vand.u32 4294901760, %v3846_v55  ;;  %v3862_v26 = vsub.f32 %v2935_v58, %v2935_v58 }
  0xbb   :  { %5581 = vst [vmem:[#allocation47_spill] sm:$0xff] %v3839_v43 }
  0xbc   :  { %5584 = vst [vmem:[#allocation50_spill] sm:$0xff] %v3862_v26  ;;  %v435_v46 = vsub.f32 %v3846_v55, %v3860_v12  ;;  %v3878_v53 = vand.u32 4294901760, %v3862_v26 }
  0xbe   :  { %5589 = vst [vmem:[#allocation53_spill] sm:$0xff] %v3878_v53  ;;  %v3895_v15 = vand.u32 4294901760, %v435_v46  ;;  %v363_v0 = vsub.f32 %v3862_v26, %v3878_v53 }
  0xbf   :  { %2952 = vmatmul.msk.f32.gmra.mxu1 %vm3789_vm9, %v5361_v11  ;;  %v179_v27 = vpop.permute.xlu0 %178  ;;  %v185_v48 = vpop.permute.xlu2 %184 }
  0xc0   :  { %349 = vmatmul.f32.gmra.mxu0 %v3839_v43  ;;  %vm3873_vm12 = vcmp.eq.s32.totalorder %v179_v27, %v3613_v2  ;;  %5592 = vst [vmem:[#allocation54_spill] sm:$0xff] %v3895_v15  ;;  %v3912_v10 = vand.u32 4294901760, %v363_v0  ;;  %vm3915_vm14 = vcmp.eq.s32.totalorder %v185_v48, %v3613_v2  ;;  %v5594_v27 = vmov 0  ;;  %v286_v0 = vld [vmem:[#allocation5 + $0x170] sm:$0xff]  ;;  %v283_v43 = vld [vmem:[#allocation5 + $0x158] sm:$0xff] }
  0xc1   :  { %2962 = vmatmul.msk.f32.gmra.mxu3 %vm3808_vm10, %v5361_v11  ;;  %v5587_v52 = vsel %vm3873_vm12, 4294967295, %v5586_v52  ;;  %v2946_v47 = vsel %vm3873_vm12, 1.0, %v5359_v14  ;;  %v5595_v27 = vsel %vm3915_vm14, 4294967295, %v5594_v27  ;;  %v3934_v48 = vand.u32 4294901760, %v286_v0 }
  0xc2   :  { %429 = vmatmul.f32.gmra.mxu2 %v3855_v59  ;;  %5588 = vst [vmem:[#allocation52_spill] sm:$0xff] %v5587_v52  ;;  %v3908_v31 = vsub.f32 %v2946_v47, %v2946_v47  ;;  %v3982_v1 = vand.u32 4294901760, %v283_v43 }
  0xc3   :  { %5593 = vst [vmem:[#allocation55_spill] sm:$0xff] %v3912_v10  ;;  %1133 = vmatpush.msra.mxu2 %v3934_v48  ;;  %v3940_v59 = vsub.f32 %v286_v0, %v3934_v48  ;;  %1606 = vmatpush.msra.mxu1 %v3934_v48 }
  0xc4   :  { %5596 = vst [vmem:[#allocation56_spill] sm:$0xff] %v5595_v27  ;;  %v3920_v46 = vand.u32 4294901760, %v3908_v31  ;;  %v3987_v50 = vsub.f32 %v283_v43, %v3982_v1 }
  0xc5   :  { %v172_v17 = vpop.permute.xlu1 %171  ;;  %1472 = vmatpush.msra.mxu0 %v3940_v59  ;;  %1608 = vmatpush.msra.mxu1 %v3982_v1 }
  0xc6   :  { %vm3881_vm13 = vcmp.eq.s32.totalorder %v172_v17, %v3613_v2  ;;  %v449_v47 = vsub.f32 %v3908_v31, %v3920_v46  ;;  %1135 = vmatpush.msra.mxu2 %v3982_v1 }
  0xc7   :  { %2953 = vmatmul.msk.f32.gmra.mxu1 %vm3835_vm11, %v5361_v11  ;;  %v2945_v44 = vsel %vm3881_vm13, 1.0, %v5359_v14  ;;  %1475 = vmatpush.msra.mxu0 %v3987_v50 }
  0xc8   :  { %357 = vmatmul.f32.gmra.mxu0 %v3868_v39  ;;  %v3897_v16 = vsub.f32 %v2945_v44, %v2945_v44  ;;  %v2947_v44 = vsel %vm3915_vm14, 1.0, %v5359_v14  ;;  %v5598_v14 = vmov 0 }
  0xc9   :  { %2963 = vmatmul.msk.f32.gmra.mxu3 %vm3881_vm13, %v5361_v11 }
  0xca   :  { %437 = vmatmul.f32.gmra.mxu2 %v3895_v15  ;;  %v3906_v18 = vand.u32 4294901760, %v3897_v16 }
  0xcc   :  { %v442_v58 = vsub.f32 %v3897_v16, %v3906_v18 }
  0xce   :  { %v3922_v17 = vand.u32 4294901760, %v442_v58  ;;  %v3936_v58 = vsub.f32 %v2947_v44, %v2947_v44  ;;  %v5603_v44 = vmov 0.0  }
  0xd0   :  { %5597 = vst [vmem:[#allocation57_spill] sm:$0xff] %v3922_v17  ;;  %365 = vmatmul.f32.gmra.mxu0 %v3912_v10  ;;  %v3960_v57 = vand.u32 4294901760, %v3936_v58 }
  0xd1   :  { %2964 = vmatmul.msk.f32.gmra.mxu3 %vm3873_vm12, %v5361_v11  ;;  %v3948_v11 = vand.u32 4294901760, %v449_v47 }
  0xd2   :  { %444 = vmatmul.f32.gmra.mxu2 %v3922_v17  ;;  %v5602_v17 = vmov 1.0   ;;  %v456_v42 = vsub.f32 %v3936_v58, %v3960_v57 }
  0xd3   :  { %5601 = vst [vmem:[#allocation59_spill] sm:$0xff] %v3948_v11 }
  0xd5   :  { %v114_v15 = vpop.permute.xlu1 %113 }
  0xd6   :  { %vm3944_vm15 = vcmp.eq.s32.totalorder %v114_v15, %v3613_v2  ;;  %v5383_v15 = vand.u32 4294901760, %v3940_v59 }
  0xd7   :  { %v5599_v14 = vsel %vm3944_vm15, 4294967295, %v5598_v14  ;;  %2954 = vmatmul.msk.f32.gmra.mxu1 %vm3944_vm15, %v5602_v17  ;;  %v2936_v13 = vsel %vm3944_vm15, 1.0, %v5603_v44 }
  0xd8   :  { %5600 = vst [vmem:[#allocation58_spill] sm:$0xff] %v5599_v14  ;;  %v3957_v0 = vsub.f32 %v2936_v13, %v2936_v13  ;;  %v1308_v21 = vsub.f32 %v3940_v59, %v5383_v15  ;;  %v127_v15 = vpop.permute.xlu2 %126 }
  0xd9   :  { %2965 = vmatmul.msk.f32.gmra.mxu3 %vm3915_vm14, %v5602_v17  ;;  %vm3992_vm14 = vcmp.eq.s32.totalorder %v127_v15, %v3613_v2 }
  0xda   :  { %5604 = vst [vmem:[#allocation60_spill] sm:$0xff] %v3957_v0  ;;  %451 = vmatmul.f32.gmra.mxu2 %v3948_v11  ;;  %v3968_v47 = vand.u32 4294901760, %v3957_v0  ;;  %v1309_v10 = vand.u32 4294901760, %v1308_v21  ;;  %v3980_v11 = vand.u32 4294901760, %v456_v42  ;;  %v5608_v21 = vmov 0 }
  0xdb   :  { %v5609_v21 = vsel %vm3992_vm14, 4294967295, %v5608_v21  ;;  %v5396_v42 = vand.u32 4294901760, %v3987_v50 }
  0xdc   :  { %5605 = vst [vmem:[#allocation61_spill] sm:$0xff] %v3968_v47  ;;  %v371_v13 = vsub.f32 %v3957_v0, %v3968_v47  ;;  %1310 = vmatpush.msra.mxu3 %v1309_v10 }
  0xdd   :  { %5607 = vst [vmem:[#allocation63_spill] sm:$0xff] %v3980_v11  ;;  %v1314_v43 = vsub.f32 %v3987_v50, %v5396_v42 }
  0xde   :  { %v3977_v39 = vand.u32 4294901760, %v371_v13  ;;  %5610 = vst [vmem:[#allocation64_spill] sm:$0xff] %v5609_v21  ;;  %v5611_v13 = vmov 0  ;;  %v244_v21 = vld [vmem:[#allocation5 + $0x20] sm:$0xff] }
  0xe0   :  { %5606 = vst [vmem:[#allocation62_spill] sm:$0xff] %v3977_v39  ;;  %373 = vmatmul.f32.gmra.mxu0 %v3977_v39  ;;  %v280_v39 = vld [vmem:[#allocation5 + $0x140] sm:$0xff] }
  0xe1   :  { %796 = vmatmul.f32.vlgmr.msrb.gmra.mxu3 %v3665_v25  ;;  %v4018_v25 = vand.u32 4294901760, %v280_v39 }
  0xe2   :  { %458 = vmatmul.f32.gmra.mxu2 %v3980_v11  ;;  %v2938_v11 = vsel %vm3992_vm14, 1.0, %v5603_v44 }
  0xe3   :  { %v4024_v27 = vsub.f32 %v2938_v11, %v2938_v11  ;;  %1137 = vmatpush.msra.mxu2 %v4018_v25  ;;  %1610 = vmatpush.msra.mxu1 %v4018_v25 }
  0xe5   :  { %v120_v10 = vpop.permute.xlu1 %119  ;;  %5616 = vst [vmem:[#allocation68_spill] sm:$0xff] %v4024_v27  ;;  %v4038_v11 = vand.u32 4294901760, %v4024_v27 }
  0xe6   :  { %vm3999_vm12 = vcmp.eq.s32.totalorder %v120_v10, %v3613_v2  ;;  %v1315_v10 = vand.u32 4294901760, %v1314_v43 }
  0xe7   :  { %v5612_v13 = vsel %vm3999_vm12, 4294967295, %v5611_v13  ;;  %2955 = vmatmul.msk.f32.gmra.mxu1 %vm3999_vm12, %v5602_v17  ;;  %v2937_v15 = vsel %vm3999_vm12, 1.0, %v5603_v44  ;;  %v4028_v44 = vsub.f32 %v280_v39, %v4018_v25  ;;  %5618 = vst [vmem:[#allocation70_spill] sm:$0xff] %v4038_v11 }
  0xe8   :  { %5613 = vst [vmem:[#allocation65_spill] sm:$0xff] %v5612_v13  ;;  %v4015_v2 = vsub.f32 %v2937_v15, %v2937_v15  ;;  %1316 = vmatpush.msra.mxu3 %v1315_v10 }
  0xe9   :  { %802 = vmatmul.f32.gmra.mxu3 %v3684_v41  ;;  %v5407_v15 = vand.u32 4294901760, %v4028_v44  ;;  %1478 = vmatpush.msra.mxu0 %v4028_v44  ;;  %v277_v41 = vld [vmem:[#allocation5 + $0x128] sm:$0xff] }
  0xea   :  { %5614 = vst [vmem:[#allocation66_spill] sm:$0xff] %v4015_v2  ;;  %676 = vmatmul.f32.vlgmr.msrb.gmra.mxu2 %v3653_v23  ;;  %v4022_v42 = vand.u32 4294901760, %v4015_v2  ;;  %v4051_v36 = vand.u32 4294901760, %v277_v41 }
  0xeb   :  { %v1320_v39 = vsub.f32 %v4028_v44, %v5407_v15 }
  0xec   :  { %5615 = vst [vmem:[#allocation67_spill] sm:$0xff] %v4022_v42  ;;  %v379_v43 = vsub.f32 %v4015_v2, %v4022_v42  ;;  %1139 = vmatpush.msra.mxu2 %v4051_v36  ;;  %v4055_v52 = vsub.f32 %v277_v41, %v4051_v36  ;;  %1612 = vmatpush.msra.mxu1 %v4051_v36 }
  0xed   :  { %v1321_v10 = vand.u32 4294901760, %v1320_v39 }
  0xee   :  { %v4035_v23 = vand.u32 4294901760, %v379_v43  ;;  %v387_v43 = vsub.f32 %v4024_v27, %v4038_v11  ;;  %v5412_v39 = vand.u32 4294901760, %v4055_v52  ;;  %1481 = vmatpush.msra.mxu0 %v4055_v52 }
  0xef   :  { %2956 = vmatmul.msk.f32.gmra.mxu1 %vm3992_vm14, %v5602_v17  ;;  %1322 = vmatpush.msra.mxu3 %v1321_v10 }
  0xf0   :  { %5617 = vst [vmem:[#allocation69_spill] sm:$0xff] %v4035_v23  ;;  %381 = vmatmul.f32.gmra.mxu0 %v4035_v23  ;;  %v4058_v15 = vand.u32 4294901760, %v387_v43  ;;  %v1326_v10 = vsub.f32 %v4055_v52, %v5412_v39  ;;  %v274_v43 = vld [vmem:[#allocation5 + $0x110] sm:$0xff] }
  0xf1   :  { %808 = vmatmul.f32.gmra.mxu3 %v3786_v32  ;;  %v4071_v23 = vand.u32 4294901760, %v274_v43 }
  0xf2   :  { %681 = vmatmul.f32.gmra.mxu2 %v3669_v30  ;;  %5619 = vst [vmem:[#allocation71_spill] sm:$0xff] %v4058_v15  ;;  %v1327_v41 = vand.u32 4294901760, %v1326_v10 }
  0xf3   :  { %1141 = vmatpush.msra.mxu2 %v4071_v23  ;;  %v4075_v30 = vsub.f32 %v274_v43, %v4071_v23  ;;  %1614 = vmatpush.msra.mxu1 %v4071_v23 }
  0xf4   :  { %1328 = vmatpush.msra.mxu3 %v1327_v41  ;;  %v271_v41 = vld [vmem:[#allocation5 + $0xf8] sm:$0xff] }
  0xf5   :  { %v5417_v39 = vand.u32 4294901760, %v4075_v30  ;;  %1484 = vmatpush.msra.mxu0 %v4075_v30 }
  0xf7   :  { %2984 = vmatmul.msk.f32.vlgmr.msrb.gmra.mxu1 %vm3631_vm1, %v5602_v17  ;;  %v1332_v10 = vsub.f32 %v4075_v30, %v5417_v39 }
  0xf8   :  { %389 = vmatmul.f32.gmra.mxu0 %v4058_v15  ;;  %v4091_v15 = vand.u32 4294901760, %v271_v41 }
  0xf9   :  { %814 = vmatmul.f32.gmra.mxu3 %v3800_v51  ;;  %v1333_v43 = vand.u32 4294901760, %v1332_v10 }
  0xfa   :  { %686 = vmatmul.f32.gmra.mxu2 %v3770_v8  ;;  %v4095_v8 = vsub.f32 %v271_v41, %v4091_v15  ;;  %1616 = vmatpush.msra.mxu1 %v4091_v15 }
  0xfb   :  { %1334 = vmatpush.msra.mxu3 %v1333_v43  ;;  %1143 = vmatpush.msra.mxu2 %v4091_v15  ;;  %v268_v43 = vld [vmem:[#allocation5 + $0xe0] sm:$0xff] }
  0xfc   :  { %v5422_v39 = vand.u32 4294901760, %v4095_v8  ;;  %1487 = vmatpush.msra.mxu0 %v4095_v8 }
  0xfe   :  { %v1338_v10 = vsub.f32 %v4095_v8, %v5422_v39  ;;  %v265_v39 = vld [vmem:[#allocation5 + $0xc8] sm:$0xff] }
  0xff   :  { %2985 = vmatmul.msk.f32.gmra.mxu1 %vm3621_vm0, %v5602_v17 }
 0x100   :  { %2966 = vmatmul.msk.f32.vlgmr.msrb.gmra.mxu0 %vm3631_vm1, %v5602_v17  ;;  %v1339_v41 = vand.u32 4294901760, %v1338_v10 }
 0x101   :  { %820 = vmatmul.f32.gmra.mxu3 %v3844_v54 }
 0x102   :  { %691 = vmatmul.f32.gmra.mxu2 %v3793_v38  ;;  %1340 = vmatpush.msra.mxu3 %v1339_v41  ;;  %v4111_v38 = vand.u32 4294901760, %v268_v43 }
 0x104   :  { %1145 = vmatpush.msra.mxu2 %v4111_v38  ;;  %v4118_v54 = vsub.f32 %v268_v43, %v4111_v38  ;;  %1618 = vmatpush.msra.mxu1 %v4111_v38 }
 0x106   :  { %v5427_v10 = vand.u32 4294901760, %v4118_v54  ;;  %1490 = vmatpush.msra.mxu0 %v4118_v54 }
 0x107   :  { %2986 = vmatmul.msk.f32.gmra.mxu1 %vm3748_vm6, %v5602_v17 }
 0x108   :  { %2967 = vmatmul.msk.f32.gmra.mxu0 %vm3621_vm0, %v5602_v17  ;;  %v1344_v41 = vsub.f32 %v4118_v54, %v5427_v10 }
 0x109   :  { %826 = vmatmul.f32.gmra.mxu3 %v3878_v53 }
 0x10a   :  { %696 = vmatmul.f32.gmra.mxu2 %v3825_v24  ;;  %v1345_v43 = vand.u32 4294901760, %v1344_v41  ;;  %v4134_v24 = vand.u32 4294901760, %v265_v39 }
 0x10c   :  { %1346 = vmatpush.msra.mxu3 %v1345_v43  ;;  %1147 = vmatpush.msra.mxu2 %v4134_v24 }
 0x10d   :  { %1620 = vmatpush.msra.mxu1 %v4134_v24 }
 0x10f   :  { %2987 = vmatmul.msk.f32.gmra.mxu1 %vm3766_vm8, %v5602_v17 }
 0x110   :  { %2968 = vmatmul.msk.f32.gmra.mxu0 %vm3748_vm6, %v5602_v17 }
 0x111   :  { %832 = vmatmul.f32.gmra.mxu3 %v3968_v47 }
 0x112   :  { %701 = vmatmul.f32.gmra.mxu2 %v3862_v26  ;;  %v4142_v26 = vsub.f32 %v265_v39, %v4134_v24 }
 0x114   :  { %v4145_v41 = vpop.f32.mrf.mxu3  ;;  %v5434_v43 = vand.u32 4294901760, %v4142_v26  ;;  %1493 = vmatpush.msra.mxu0 %v4142_v26 }
 0x115   :  { %5620 = vst [vmem:[#allocation72_spill] sm:$0xff] %v4145_v41  ;;  %v4194_v51 = vpop.f32.mrf.mxu0 }
 0x116   :  { %v1350_v10 = vsub.f32 %v4142_v26, %v5434_v43 }
 0x117   :  { %2988 = vmatmul.msk.f32.gmra.mxu1 %vm3789_vm9, %v5602_v17 }
 0x118   :  { %2969 = vmatmul.msk.f32.gmra.mxu0 %vm3766_vm8, %v5602_v17  ;;  %v1351_v39 = vand.u32 4294901760, %v1350_v10  ;;  %v4170_v10 = vpop.f32.mrf.mxu1 }
 0x119   :  { %838 = vmatmul.f32.gmra.mxu3 %v4022_v42  ;;  %v262_v42 = vld [vmem:[#allocation5 + $0xb0] sm:$0xff] }
 0x11a   :  { %706 = vmatmul.f32.gmra.mxu2 %v3957_v0  ;;  %v4156_v47 = vand.u32 4294901760, %v262_v42  ;;  %1352 = vmatpush.msra.mxu3 %v1351_v39  ;;  %v259_v39 = vld [vmem:[#allocation5 + $0x98] sm:$0xff] }
 0x11c   :  { %1149 = vmatpush.msra.mxu2 %v4156_v47  ;;  %v4164_v0 = vsub.f32 %v262_v42, %v4156_v47  ;;  %1622 = vmatpush.msra.mxu1 %v4156_v47 }
 0x11d   :  { %v4172_v53 = vpop.f32.mrf.mxu2  ;;  %v4224_v14 = vpop.f32.mrf.mxu0 }
 0x11e   :  { %v5441_v43 = vand.u32 4294901760, %v4164_v0  ;;  %1496 = vmatpush.msra.mxu0 %v4164_v0  ;;  %5621 = vst [vmem:[#allocation73_spill] sm:$0xff] %v4172_v53 }
 0x11f   :  { %2989 = vmatmul.msk.f32.gmra.mxu1 %vm3835_vm11, %v5602_v17 }
 0x120   :  { %2970 = vmatmul.msk.f32.gmra.mxu0 %vm3789_vm9, %v5602_v17  ;;  %v4196_v32 = vpop.f32.mrf.mxu1 }
 0x121   :  { %844 = vmatmul.f32.gmra.mxu3 %v4038_v11  ;;  %v1356_v11 = vsub.f32 %v4164_v0, %v5441_v43 }
 0x122   :  { %711 = vmatmul.f32.gmra.mxu2 %v4015_v2  ;;  %v4183_v2 = vand.u32 4294901760, %v259_v39 }
 0x123   :  { %v1357_v42 = vand.u32 4294901760, %v1356_v11 }
 0x124   :  { %v599_v41 = vpop.f32.mrf.mxu3  ;;  %v4188_v53 = vsub.f32 %v259_v39, %v4183_v2  ;;  %1151 = vmatpush.msra.mxu2 %v4183_v2  ;;  %1624 = vmatpush.msra.mxu1 %v4183_v2 }
 0x125   :  { %1358 = vmatpush.msra.mxu3 %v1357_v42 }
 0x126   :  { %v5454_v43 = vand.u32 4294901760, %v4188_v53  ;;  %1499 = vmatpush.msra.mxu0 %v4188_v53 }
 0x127   :  { %2990 = vmatmul.msk.f32.gmra.mxu1 %vm3944_vm15, %v5602_v17 }
 0x128   :  { %2971 = vmatmul.msk.f32.gmra.mxu0 %vm3835_vm11, %v5602_v17  ;;  %v1362_v42 = vsub.f32 %v4188_v53, %v5454_v43 }
 0x129   :  { %850 = vmatmul.f32.gmra.mxu3 %v3677_v35 }
 0x12a   :  { %716 = vmatmul.f32.gmra.mxu2 %v4024_v27  ;;  %v1363_v39 = vand.u32 4294901760, %v1362_v42  ;;  %v256_v27 = vld [vmem:[#allocation5 + $0x80] sm:$0xff] }
 0x12b   :  { %v4210_v34 = vand.u32 4294901760, %v256_v27 }
 0x12c   :  { %v603_v11 = vpop.f32.mrf.mxu3  ;;  %1364 = vmatpush.msra.mxu3 %v1363_v39  ;;  %v4220_v42 = vpop.f32.mrf.mxu1 }
 0x12d   :  { %v406_v37 = vpop.f32.mrf.mxu2  ;;  %1153 = vmatpush.msra.mxu2 %v4210_v34  ;;  %1626 = vmatpush.msra.mxu1 %v4210_v34  ;;  %5623 = vst [vmem:[#allocation75_spill] sm:$0xff] %v4220_v42 }
 0x12e   :  { %v4198_v35 = vadd.f32 %v599_v41, %v406_v37  ;;  %v4215_v37 = vsub.f32 %v256_v27, %v4210_v34 }
 0x12f   :  { %2991 = vmatmul.msk.f32.gmra.mxu1 %vm3999_vm12, %v5602_v17 }
 0x130   :  { %5622 = vst [vmem:[#allocation74_spill] sm:$0xff] %v4198_v35  ;;  %2972 = vmatmul.msk.f32.gmra.mxu0 %vm3944_vm15, %v5602_v17  ;;  %v5461_v35 = vand.u32 4294901760, %v4215_v37 }
 0x131   :  { %856 = vmatmul.f32.gmra.mxu3 %v3720_v63  ;;  %1502 = vmatpush.msra.mxu0 %v4215_v37 }
 0x132   :  { %721 = vmatmul.f32.gmra.mxu2 %v3667_v29  ;;  %v1368_v27 = vsub.f32 %v4215_v37, %v5461_v35  ;;  %v253_v29 = vld [vmem:[#allocation5 + $0x68] sm:$0xff] }
 0x134   :  { %v607_v41 = vpop.f32.mrf.mxu3  ;;  %v1369_v39 = vand.u32 4294901760, %v1368_v27  ;;  %v4244_v13 = vpop.f32.mrf.mxu1 }
 0x135   :  { %v414_v43 = vpop.f32.mrf.mxu2  ;;  %5625 = vst [vmem:[#allocation77_spill] sm:$0xff] %v4244_v13 }
 0x136   :  { %v4222_v63 = vadd.f32 %v603_v11, %v414_v43  ;;  %v4237_v43 = vand.u32 4294901760, %v253_v29  ;;  %1370 = vmatpush.msra.mxu3 %v1369_v39  ;;  %v250_v39 = vld [vmem:[#allocation5 + $0x50] sm:$0xff] }
 0x137   :  { %2992 = vmatmul.msk.f32.gmra.mxu1 %vm3992_vm14, %v5602_v17 }
 0x138   :  { %5624 = vst [vmem:[#allocation76_spill] sm:$0xff] %v4222_v63  ;;  %2973 = vmatmul.msk.f32.gmra.mxu0 %vm3999_vm12, %v5602_v17  ;;  %1155 = vmatpush.msra.mxu2 %v4237_v43  ;;  %v4241_v63 = vsub.f32 %v253_v29, %v4237_v43 }
 0x139   :  { %862 = vmatmul.f32.gmra.mxu3 %v3734_v22  ;;  %1628 = vmatpush.msra.mxu1 %v4237_v43 }
 0x13a   :  { %726 = vmatmul.f32.gmra.mxu2 %v3717_v60  ;;  %v5474_v27 = vand.u32 4294901760, %v4241_v63  ;;  %1505 = vmatpush.msra.mxu0 %v4241_v63  ;;  %v4250_v60 = vpop.f32.mrf.mxu0 }
 0x13b   :  { %5627 = vst [vmem:[#allocation79_spill] sm:$0xff] %v4250_v60 }
 0x13c   :  { %v611_v11 = vpop.f32.mrf.mxu3  ;;  %v1374_v29 = vsub.f32 %v4241_v63, %v5474_v27 }
 0x13d   :  { %v422_v35 = vpop.f32.mrf.mxu2 }
 0x13e   :  { %v4246_v62 = vadd.f32 %v607_v41, %v422_v35  ;;  %v4261_v35 = vand.u32 4294901760, %v250_v39  ;;  %v247_v41 = vld [vmem:[#allocation5 + $0x38] sm:$0xff]  ;;  %v1375_v22 = vand.u32 4294901760, %v1374_v29  ;;  %v4277_v29 = vand.u32 4294901760, %v244_v21 }
 0x13f   :  { %2993 = vmatmul.msk.f32.gmra.mxu1 %vm3649_vm2, %v5602_v17  ;;  %v4268_v13 = vand.u32 4294901760, %v247_v41 }
 0x140   :  { %5626 = vst [vmem:[#allocation78_spill] sm:$0xff] %v4246_v62  ;;  %2974 = vmatmul.msk.f32.gmra.mxu0 %vm3992_vm14, %v5602_v17  ;;  %v4266_v62 = vsub.f32 %v250_v39, %v4261_v35  ;;  %1630 = vmatpush.msra.mxu1 %v4261_v35 }
 0x141   :  { %868 = vmatmul.f32.gmra.mxu3 %v3773_v9  ;;  %1157 = vmatpush.msra.mxu2 %v4261_v35  ;;  %v4274_v9 = vsub.f32 %v247_v41, %v4268_v13  ;;  %v4292_v41 = vsub.f32 %v244_v21, %v4277_v29 }
 0x142   :  { %731 = vmatmul.f32.gmra.mxu2 %v3722_v4  ;;  %1376 = vmatpush.msra.mxu3 %v1375_v22  ;;  %v5479_v27 = vand.u32 4294901760, %v4266_v62  ;;  %v241_v4 = vld [vmem:[#allocation5 + $0x8] sm:$0xff] }
 0x143   :  { %1508 = vmatpush.msra.mxu0 %v4266_v62  ;;  %1159 = vmatpush.msra.mxu2 %v4268_v13  ;;  %v4294_v60 = vand.u32 4294901760, %v241_v4  ;;  %v1391_v21 = vand.u32 4294901760, %v4292_v41 }
 0x144   :  { %v615_v40 = vpop.f32.mrf.mxu3  ;;  %1632 = vmatpush.msra.mxu1 %v4268_v13  ;;  %v1380_v22 = vsub.f32 %v4266_v62, %v5479_v27 }
 0x145   :  { %v430_v39 = vpop.f32.mrf.mxu2  ;;  %v5482_v40 = vand.u32 4294901760, %v4274_v9  ;;  %1511 = vmatpush.msra.mxu0 %v4274_v9  ;;  %1161 = vmatpush.msra.mxu2 %v4277_v29  ;;  %v4311_v3 = vsub.f32 %v241_v4, %v4294_v60  ;;  %v5631_v4 = vand.u32 4294901760, %v3940_v59  ;;  %v5633_v59 = vand.u32 4294901760, %v4028_v44 }
 0x146   :  { %v4281_v42 = vadd.f32 %v611_v11, %v430_v39  ;;  %v4297_v11 = vpop.f32.mrf.mxu1  ;;  %v1381_v39 = vand.u32 4294901760, %v1380_v22  ;;  %1634 = vmatpush.msra.mxu1 %v4277_v29  ;;  %v5635_v44 = vand.u32 4294901760, %v4075_v30 }
 0x147   :  { %2994 = vmatmul.msk.f32.gmra.mxu1 %vm3703_vm4, %v5602_v17  ;;  %5629 = vst [vmem:[#allocation81_spill] sm:$0xff] %v4297_v11  ;;  %v1386_v27 = vsub.f32 %v4274_v9, %v5482_v40  ;;  %1163 = vmatpush.msra.mxu2 %v4294_v60  ;;  %v1392_v40 = vsub.f32 %v4292_v41, %v1391_v21  ;;  %v1397_v20 = vand.u32 4294901760, %v4311_v3 }
 0x148   :  { %5628 = vst [vmem:[#allocation80_spill] sm:$0xff] %v4281_v42  ;;  %2975 = vmatmul.msk.f32.gmra.mxu0 %vm3649_vm2, %v5602_v17  ;;  %v4306_v42 = vpop.f32.mrf.mxu0  ;;  %1382 = vmatpush.msra.mxu3 %v1381_v39  ;;  %v5632_v39 = vand.u32 4294901760, %v3987_v50 }
 0x149   :  { %5630 = vst [vmem:[#allocation82_spill] sm:$0xff] %v4306_v42  ;;  %874 = vmatmul.f32.gmra.mxu3 %v3823_v19  ;;  %v1387_v22 = vand.u32 4294901760, %v1386_v27  ;;  %1514 = vmatpush.msra.mxu0 %v4292_v41  ;;  %v1393_v42 = vand.u32 4294901760, %v1392_v40  ;;  %v1398_v27 = vsub.f32 %v4311_v3, %v1397_v20 }
 0x14a   :  { %736 = vmatmul.f32.gmra.mxu2 %v3745_v33  ;;  %1636 = vmatpush.msra.mxu1 %v4294_v60 }
 0x14b   :  { %1388 = vmatpush.msra.mxu3 %v1387_v22  ;;  %1745 = vmatpush.msrb.mxu2 %v5631_v4 }
 0x14c   :  { %v618_v19 = vpop.f32.mrf.mxu3  ;;  %1517 = vmatpush.msra.mxu0 %v4311_v3  ;;  %v287_v3 = vld [vmem:[#allocation5 + $0x178] sm:$0xff] }
 0x14d   :  { %v438_v11 = vpop.f32.mrf.mxu2  ;;  %1749 = vmatpush.msrb.mxu2 %v5632_v39  ;;  %1394 = vmatpush.msra.mxu3 %v1393_v42  ;;  %v1399_v19 = vand.u32 4294901760, %v1398_v27  ;;  %v5634_v42 = vand.u32 4294901760, %v4055_v52  ;;  %v5636_v52 = vand.u32 4294901760, %v4095_v8  ;;  %v5638_v8 = vand.u32 4294901760, %v4142_v26 }
 0x14e   :  { %v4338_v40 = vpop.f32.mrf.mxu1  ;;  %v5642_v27 = vand.u32 4294901760, %v4241_v63  ;;  %v5644_v63 = vand.u32 4294901760, %v4274_v9 }
 0x14f   :  { %2995 = vmatmul.msk.f32.gmra.mxu1 %vm3696_vm3, %v5602_v17  ;;  %1753 = vmatpush.msrb.mxu2 %v5633_v59  ;;  %v284_v59 = vld [vmem:[#allocation5 + $0x160] sm:$0xff] }
 0x150   :  { %2976 = vmatmul.msk.f32.gmra.mxu0 %vm3703_vm4, %v5602_v17  ;;  %1400 = vmatpush.msra.mxu3 %v1399_v19  ;;  %v4341_v50 = vpop.f32.mrf.mxu0  ;;  %v5648_v19 = vld [vmem:[#allocation19_spill] sm:$0xff] }
 0x151   :  { %880 = vmatmul.f32.gmra.mxu3 %v3860_v12  ;;  %1757 = vmatpush.msrb.mxu2 %v5634_v42 }
 0x152   :  { %741 = vmatmul.f32.gmra.mxu2 %v3802_v61  ;;  %1876 = vmatpush.msrb.mxu3 %v3934_v48 }
 0x153   :  { %1761 = vmatpush.msrb.mxu2 %v5635_v44  ;;  %v5650_v44 = vld [vmem:[#allocation75_spill] sm:$0xff] }
 0x154   :  { %v621_v11 = vpop.f32.mrf.mxu3  ;;  %1878 = vmatpush.msrb.mxu3 %v3982_v1  ;;  %v5637_v1 = vand.u32 4294901760, %v4118_v54  ;;  %v5641_v54 = vand.u32 4294901760, %v4215_v37 }
 0x155   :  { %v445_v22 = vpop.f32.mrf.mxu2  ;;  %1765 = vmatpush.msrb.mxu2 %v5636_v52  ;;  %v4458_v11 = vand.u32 4294901760, %v284_v59 }
 0x156   :  { %1880 = vmatpush.msrb.mxu3 %v4018_v25  ;;  %v4365_v48 = vpop.f32.mrf.mxu1  ;;  %v5649_v22 = vld [vmem:[#allocation79_spill] sm:$0xff] }
 0x157   :  { %2996 = vmatmul.msk.f32.gmra.mxu1 %vm3725_vm5, %v5602_v17  ;;  %1769 = vmatpush.msrb.mxu2 %v5637_v1  ;;  %v568_v52 = vadd.f32 %v5650_v44, %v5649_v22  ;;  %v5658_v44 = vld [vmem:[#allocation15_spill] sm:$0xff] }
 0x158   :  { %2977 = vmatmul.msk.f32.gmra.mxu0 %vm3696_vm3, %v5602_v17  ;;  %1882 = vmatpush.msrb.mxu3 %v4051_v36  ;;  %v4361_v30 = vpop.f32.mrf.mxu0  ;;  %v5639_v36 = vand.u32 4294901760, %v4164_v0 }
 0x159   :  { %885 = vmatmul.f32.gmra.mxu3 %v3906_v18  ;;  %1773 = vmatpush.msrb.mxu2 %v5638_v8 }
 0x15a   :  { %746 = vmatmul.f32.gmra.mxu2 %v3846_v55  ;;  %1884 = vmatpush.msrb.mxu3 %v4071_v23  ;;  %v5640_v23 = vand.u32 4294901760, %v4188_v53 }
 0x15b   :  { %1777 = vmatpush.msrb.mxu2 %v5639_v36  ;;  %v4465_v36 = vsub.f32 %v284_v59, %v4458_v11 }
 0x15c   :  { %v624_v25 = vpop.f32.mrf.mxu3  ;;  %1886 = vmatpush.msrb.mxu3 %v4091_v15 }
 0x15d   :  { %v452_v4 = vpop.f32.mrf.mxu2  ;;  %1781 = vmatpush.msrb.mxu2 %v5640_v23 }
 0x15e   :  { %1888 = vmatpush.msrb.mxu3 %v4111_v38 }
 0x15f   :  { %2997 = vmatmul.msk.f32.gmra.mxu1 %vm3753_vm7, %v5602_v17  ;;  %1785 = vmatpush.msrb.mxu2 %v5641_v54 }
 0x160   :  { %2978 = vmatmul.msk.f32.gmra.mxu0 %vm3725_vm5, %v5602_v17  ;;  %1890 = vmatpush.msrb.mxu3 %v4134_v24  ;;  %v4390_v15 = vpop.f32.mrf.mxu0  ;;  %v5643_v24 = vand.u32 4294901760, %v4266_v62  ;;  %v560_v62 = vadd.f32 %v4170_v10, %v4194_v51 }
 0x161   :  { %890 = vmatmul.f32.gmra.mxu3 %v3920_v46  ;;  %1789 = vmatpush.msrb.mxu2 %v5642_v27 }
 0x162   :  { %750 = vmatmul.f32.gmra.mxu2 %v3897_v16  ;;  %1892 = vmatpush.msrb.mxu3 %v4156_v47 }
 0x163   :  { %1793 = vmatpush.msrb.mxu2 %v5643_v24 }
 0x164   :  { %v4387_v26 = vpop.f32.mrf.mxu1  ;;  %v797_v0 = vpop.f32.mrf.mxu3  ;;  %1894 = vmatpush.msrb.mxu3 %v4183_v2 }
 0x165   :  { %v459_v38 = vpop.f32.mrf.mxu2  ;;  %1797 = vmatpush.msrb.mxu2 %v5644_v63 }
 0x166   :  { %1896 = vmatpush.msrb.mxu3 %v4210_v34  ;;  %v5492_v38 = vand.u32 4294901760, %v4465_v36 }
 0x167   :  { %2998 = vmatmul.msk.f32.gmra.mxu1 %vm3808_vm10, %v5602_v17  ;;  %1801 = vmatpush.msrb.mxu2 %v1391_v21 }
 0x168   :  { %2979 = vmatmul.msk.f32.gmra.mxu0 %vm3753_vm7, %v5602_v17  ;;  %1898 = vmatpush.msrb.mxu3 %v4237_v43 }
 0x169   :  { %895 = vmatmul.f32.gmra.mxu3 %v3960_v57  ;;  %1805 = vmatpush.msrb.mxu2 %v1397_v20  ;;  %v4433_v20 = vand.u32 4294901760, %v287_v3 }
 0x16a   :  { %754 = vmatmul.f32.gmra.mxu2 %v3908_v31  ;;  %1900 = vmatpush.msrb.mxu3 %v4261_v35 }
 0x16b   :  { %1977 = vmatpush.msrb.mxu0 %v4433_v20 }
 0x16c   :  { %v4413_v53 = vpop.f32.mrf.mxu1  ;;  %v803_v47 = vpop.f32.mrf.mxu3  ;;  %1902 = vmatpush.msrb.mxu3 %v4268_v13  ;;  %v564_v13 = vadd.f32 %v4196_v32, %v4224_v14  ;;  %v5647_v32 = vld [vmem:[#allocation12_spill] sm:$0xff] }
 0x16d   :  { %v4416_v34 = vpop.f32.mrf.mxu0  ;;  %v677_v2 = vpop.f32.mrf.mxu2  ;;  %1979 = vmatpush.msrb.mxu0 %v4458_v11 }
 0x16e   :  { %v678_v9 = vadd.f32 %v677_v2, %v560_v62  ;;  %1904 = vmatpush.msrb.mxu3 %v4277_v29  ;;  %v4441_v29 = vsub.f32 %v287_v3, %v4433_v20  ;;  %v2158_v62 = vsub.f32 %v4465_v36, %v5492_v38  ;;  %v281_v2 = vld [vmem:[#allocation5 + $0x148] sm:$0xff] }
 0x16f   :  { %2999 = vmatmul.msk.f32.gmra.mxu1 %vm3881_vm13, %v5602_v17  ;;  %v5656_v3 = vld [vmem:[#allocation82_spill] sm:$0xff] }
 0x170   :  { %2980 = vmatmul.msk.f32.gmra.mxu0 %vm3808_vm10, %v5602_v17  ;;  %v798_v51 = vadd.f32 %v797_v0, %v678_v9  ;;  %1906 = vmatpush.msrb.mxu3 %v4294_v60  ;;  %v5645_v60 = vld [vmem:[#allocation52_spill] sm:$0xff]  ;;  %v5493_v21 = vand.u32 4294901760, %v4441_v29  ;;  %v2159_v9 = vand.u32 4294901760, %v2158_v62  ;;  %v278_v62 = vld [vmem:[#allocation5 + $0x130] sm:$0xff] }
 0x171   :  { %3002 = vmatmul.msk.f32.vlgmr.msra.gmra.mxu3 %vm3631_vm1, %v5602_v17  ;;  %vm5646_vm1 = vnez %v5645_v60  ;;  %v5651_v0 = vld [vmem:[#allocation56_spill] sm:$0xff] }
 0x172   :  { %758 = vmatmul.f32.gmra.mxu2 %v3936_v58  ;;  %2450 = vmatpush.msra.mxu3 %v4433_v20  ;;  %v2152_v39 = vsub.f32 %v4441_v29, %v5493_v21 }
 0x174   :  { %v809_v10 = vpop.f32.mrf.mxu3  ;;  %v1065_v37 = vpop.f32.mrf.mxu1  ;;  %v2153_v42 = vand.u32 4294901760, %v2152_v39  ;;  %2452 = vmatpush.msra.mxu3 %v4458_v11 }
 0x175   :  { %v4437_v43 = vpop.f32.mrf.mxu0  ;;  %v682_v35 = vpop.f32.mrf.mxu2 }
 0x176   :  { %v683_v41 = vadd.f32 %v682_v35, %v564_v13  ;;  %2154 = vmatpush.msrb.mxu1 %v2153_v42  ;;  %v5657_v13 = vld [vmem:[#allocation77_spill] sm:$0xff] }
 0x177   :  { %3000 = vmatmul.msk.f32.gmra.mxu1 %vm5646_vm1, %v5602_v17 }
 0x178   :  { %2981 = vmatmul.msk.f32.gmra.mxu0 %vm3881_vm13, %v5602_v17  ;;  %v804_v14 = vadd.f32 %v803_v47, %v683_v41  ;;  %v5655_v47 = vld [vmem:[#allocation23_spill] sm:$0xff]  ;;  %2160 = vmatpush.msrb.mxu1 %v2159_v9  ;;  %v4509_v9 = vand.u32 4294901760, %v278_v62 }
 0x179   :  { %3003 = vmatmul.msk.f32.gmra.mxu3 %vm3621_vm0, %v5602_v17  ;;  %vm5652_vm0 = vnez %v5651_v0 }
 0x17a   :  { %1169 = vmatmul.f32.vlgmr.msra.gmra.mxu2 %v5648_v19 }
 0x17b   :  { %2316 = vmatpush.msra.mxu2 %v4441_v29 }
 0x17c   :  { %v815_v1 = vpop.f32.mrf.mxu3  ;;  %v1069_v25 = vpop.f32.mrf.mxu1 }
 0x17d   :  { %v687_v4 = vpop.f32.mrf.mxu2  ;;  %v964_v8 = vpop.f32.mrf.mxu0  ;;  %2319 = vmatpush.msra.mxu2 %v4465_v36 }
 0x17e   :  { %v688_v23 = vadd.f32 %v687_v4, %v568_v52  ;;  %v965_v54 = vadd.f32 %v964_v8, %v798_v51  ;;  %v4485_v51 = vand.u32 4294901760, %v281_v2 }
 0x17f   :  { %3001 = vmatmul.msk.f32.gmra.mxu1 %vm5652_vm0, %v5602_v17 }
 0x180   :  { %v4473_v27 = vadd.f32 %v1065_v37, %v965_v54  ;;  %2982 = vmatmul.msk.f32.gmra.mxu0 %vm5646_vm1, %v5602_v17  ;;  %v810_v24 = vadd.f32 %v809_v10, %v688_v23  ;;  %v572_v37 = vadd.f32 %v5657_v13, %v5656_v3  ;;  %v4491_v59 = vsub.f32 %v281_v2, %v4485_v51  ;;  %v5661_v54 = vld [vmem:[#allocation42_spill] sm:$0xff] }
 0x181   :  { %3004 = vmatmul.msk.f32.gmra.mxu3 %vm3748_vm6, %v5602_v17  ;;  %1981 = vmatpush.msrb.mxu0 %v4485_v51 }
 0x182   :  { %5653 = vst [vmem:[#allocation12_spill] sm:$0xff] %v4473_v27  ;;  %1176 = vmatmul.f32.gmra.mxu2 %v5655_v47  ;;  %2454 = vmatpush.msra.mxu3 %v4485_v51  ;;  %v5491_v52 = vand.u32 4294901760, %v4491_v59 }
 0x183   :  { %2322 = vmatpush.msra.mxu2 %v4491_v59  ;;  %1983 = vmatpush.msrb.mxu0 %v4509_v9 }
 0x184   :  { %v821_v35 = vpop.f32.mrf.mxu3  ;;  %v1073_v41 = vpop.f32.mrf.mxu1  ;;  %2456 = vmatpush.msra.mxu3 %v4509_v9 }
 0x185   :  { %v692_v10 = vpop.f32.mrf.mxu2  ;;  %v968_v39 = vpop.f32.mrf.mxu0 }
 0x186   :  { %v693_v42 = vadd.f32 %v692_v10, %v572_v37  ;;  %v969_v22 = vadd.f32 %v968_v39, %v804_v14  ;;  %v2164_v14 = vsub.f32 %v4491_v59, %v5491_v52 }
 0x187   :  { %1640 = vmatmul.f32.vlgmr.msra.gmra.mxu1 %v5658_v44  ;;  %v5677_v44 = vld [vmem:[#allocation55_spill] sm:$0xff] }
 0x188   :  { %v4497_v4 = vadd.f32 %v1069_v25, %v969_v22  ;;  %2983 = vmatmul.msk.f32.gmra.mxu0 %vm5652_vm0, %v5602_v17  ;;  %v816_v8 = vadd.f32 %v815_v1, %v693_v42  ;;  %v2165_v2 = vand.u32 4294901760, %v2164_v14  ;;  %v5662_v25 = vld [vmem:[#allocation81_spill] sm:$0xff]  ;;  %v5663_v22 = vld [vmem:[#allocation20_spill] sm:$0xff]  ;;  %v5665_v14 = vld [vmem:[#allocation14_spill] sm:$0xff] }
 0x189   :  { %3005 = vmatmul.msk.f32.gmra.mxu3 %vm3766_vm8, %v5602_v17  ;;  %v576_v3 = vadd.f32 %v5662_v25, %v4341_v50  ;;  %v5667_v25 = vld [vmem:[#allocation47_spill] sm:$0xff] }
 0x18a   :  { %5659 = vst [vmem:[#allocation19_spill] sm:$0xff] %v4497_v4  ;;  %1183 = vmatmul.f32.gmra.mxu2 %v5661_v54  ;;  %2166 = vmatpush.msrb.mxu1 %v2165_v2  ;;  %v4524_v2 = vsub.f32 %v278_v62, %v4509_v9  ;;  %v5668_v4 = vld [vmem:[#allocation37_spill] sm:$0xff]  ;;  %v5708_v54 = vld [vmem:[#allocation68_spill] sm:$0xff] }
 0x18c   :  { %v827_v13 = vpop.f32.mrf.mxu3  ;;  %v1077_v37 = vpop.f32.mrf.mxu1  ;;  %2325 = vmatpush.msra.mxu2 %v4524_v2  ;;  %v5728_v60 = vand.u32 4294901760, %v4524_v2 }
 0x18d   :  { %v697_v1 = vpop.f32.mrf.mxu2  ;;  %v972_v10 = vpop.f32.mrf.mxu0 }
 0x18e   :  { %v698_v39 = vadd.f32 %v697_v1, %v576_v3  ;;  %v973_v42 = vadd.f32 %v972_v10, %v810_v24  ;;  %v580_v24 = vadd.f32 %v4338_v40, %v4361_v30  ;;  %v275_v10 = vld [vmem:[#allocation5 + $0x118] sm:$0xff]  ;;  %v5670_v30 = vld [vmem:[#allocation17_spill] sm:$0xff] }
 0x18f   :  { %1645 = vmatmul.f32.gmra.mxu1 %v5663_v22 }
 0x190   :  { %v4516_v52 = vadd.f32 %v1073_v41, %v973_v42  ;;  %1520 = vmatmul.f32.vlgmr.msra.gmra.mxu0 %v5665_v14  ;;  %v822_v38 = vadd.f32 %v821_v35, %v698_v39  ;;  %v5494_v41 = vand.u32 4294901760, %v4524_v2  ;;  %v4530_v42 = vand.u32 4294901760, %v275_v10 }
 0x191   :  { %3006 = vmatmul.msk.f32.gmra.mxu3 %vm3789_vm9, %v5602_v17 }
 0x192   :  { %5664 = vst [vmem:[#allocation79_spill] sm:$0xff] %v4516_v52  ;;  %1191 = vmatmul.f32.gmra.mxu2 %v5667_v25  ;;  %v2170_v62 = vsub.f32 %v4524_v2, %v5494_v41  ;;  %1985 = vmatpush.msrb.mxu0 %v4530_v42  ;;  %v5698_v25 = vld [vmem:[#allocation60_spill] sm:$0xff] }
 0x193   :  { %2458 = vmatpush.msra.mxu3 %v4530_v42 }
 0x194   :  { %v833_v3 = vpop.f32.mrf.mxu3  ;;  %v1081_v1 = vpop.f32.mrf.mxu1  ;;  %v2171_v14 = vand.u32 4294901760, %v2170_v62 }
 0x195   :  { %v702_v35 = vpop.f32.mrf.mxu2  ;;  %v976_v39 = vpop.f32.mrf.mxu0 }
 0x196   :  { %v703_v21 = vadd.f32 %v702_v35, %v580_v24  ;;  %v977_v52 = vadd.f32 %v976_v39, %v816_v8  ;;  %v5672_v8 = vld [vmem:[#allocation51_spill] sm:$0xff]  ;;  %2172 = vmatpush.msrb.mxu1 %v2171_v14  ;;  %v4546_v24 = vsub.f32 %v275_v10, %v4530_v42 }
 0x197   :  { %1650 = vmatmul.f32.gmra.mxu1 %v5668_v4  ;;  %v5703_v4 = vld [vmem:[#allocation66_spill] sm:$0xff] }
 0x198   :  { %v4537_v40 = vadd.f32 %v1077_v37, %v977_v52  ;;  %1524 = vmatmul.f32.gmra.mxu0 %v5670_v30  ;;  %v828_v27 = vadd.f32 %v827_v13, %v703_v21  ;;  %v584_v52 = vadd.f32 %v4365_v48, %v4390_v15  ;;  %v5495_v21 = vand.u32 4294901760, %v4546_v24  ;;  %2328 = vmatpush.msra.mxu2 %v4546_v24  ;;  %v5675_v30 = vld [vmem:[#allocation35_spill] sm:$0xff] }
 0x199   :  { %3007 = vmatmul.msk.f32.gmra.mxu3 %vm3835_vm11, %v5602_v17 }
 0x19a   :  { %5669 = vst [vmem:[#allocation75_spill] sm:$0xff] %v4537_v40  ;;  %1199 = vmatmul.f32.gmra.mxu2 %v5672_v8  ;;  %v2176_v14 = vsub.f32 %v4546_v24, %v5495_v21  ;;  %v5673_v40 = vld [vmem:[#allocation40_spill] sm:$0xff] }
 0x19c   :  { %v839_v37 = vpop.f32.mrf.mxu3  ;;  %v1085_v35 = vpop.f32.mrf.mxu1  ;;  %v2177_v15 = vand.u32 4294901760, %v2176_v14 }
 0x19d   :  { %v707_v13 = vpop.f32.mrf.mxu2  ;;  %v980_v39 = vpop.f32.mrf.mxu0 }
 0x19e   :  { %v708_v62 = vadd.f32 %v707_v13, %v584_v52  ;;  %v981_v41 = vadd.f32 %v980_v39, %v822_v38  ;;  %2178 = vmatpush.msrb.mxu1 %v2177_v15  ;;  %v272_v38 = vld [vmem:[#allocation5 + $0x100] sm:$0xff]  ;;  %v588_v13 = vadd.f32 %v4387_v26, %v4416_v34  ;;  %v5678_v15 = vld [vmem:[#allocation48_spill] sm:$0xff]  ;;  %v5680_v34 = vld [vmem:[#allocation39_spill] sm:$0xff] }
 0x19f   :  { %1656 = vmatmul.f32.gmra.mxu1 %v5673_v40  ;;  %v4563_v52 = vand.u32 4294901760, %v272_v38 }
 0x1a0   :  { %v4556_v10 = vadd.f32 %v1081_v1, %v981_v41  ;;  %1528 = vmatmul.f32.gmra.mxu0 %v5675_v30  ;;  %v834_v48 = vadd.f32 %v833_v3, %v708_v62 }
 0x1a1   :  { %3008 = vmatmul.msk.f32.gmra.mxu3 %vm3944_vm15, %v5602_v17  ;;  %1987 = vmatpush.msrb.mxu0 %v4563_v52  ;;  %v4569_v3 = vsub.f32 %v272_v38, %v4563_v52 }
 0x1a2   :  { %5674 = vst [vmem:[#allocation56_spill] sm:$0xff] %v4556_v10  ;;  %1207 = vmatmul.f32.gmra.mxu2 %v5677_v44  ;;  %2460 = vmatpush.msra.mxu3 %v4563_v52 }
 0x1a3   :  { %v5496_v10 = vand.u32 4294901760, %v4569_v3  ;;  %2331 = vmatpush.msra.mxu2 %v4569_v3 }
 0x1a4   :  { %v845_v39 = vpop.f32.mrf.mxu3  ;;  %v1089_v1 = vpop.f32.mrf.mxu1 }
 0x1a5   :  { %v712_v41 = vpop.f32.mrf.mxu2  ;;  %v984_v21 = vpop.f32.mrf.mxu0  ;;  %v2182_v38 = vsub.f32 %v4569_v3, %v5496_v10 }
 0x1a6   :  { %v713_v62 = vadd.f32 %v712_v41, %v588_v13  ;;  %v985_v14 = vadd.f32 %v984_v21, %v828_v27  ;;  %v5682_v27 = vld [vmem:[#allocation62_spill] sm:$0xff] }
 0x1a7   :  { %1662 = vmatmul.f32.gmra.mxu1 %v5678_v15  ;;  %v269_v21 = vld [vmem:[#allocation5 + $0xe8] sm:$0xff]  ;;  %v2183_v13 = vand.u32 4294901760, %v2182_v38  ;;  %v5683_v38 = vld [vmem:[#allocation53_spill] sm:$0xff] }
 0x1a8   :  { %v4575_v26 = vadd.f32 %v1085_v35, %v985_v14  ;;  %1533 = vmatmul.f32.gmra.mxu0 %v5680_v34  ;;  %v840_v30 = vadd.f32 %v839_v37, %v713_v62  ;;  %v4585_v41 = vand.u32 4294901760, %v269_v21  ;;  %v592_v35 = vadd.f32 %v4413_v53, %v4437_v43  ;;  %v5685_v43 = vld [vmem:[#allocation45_spill] sm:$0xff] }
 0x1a9   :  { %3009 = vmatmul.msk.f32.gmra.mxu3 %vm3999_vm12, %v5602_v17  ;;  %2184 = vmatpush.msrb.mxu1 %v2183_v13 }
 0x1aa   :  { %5679 = vst [vmem:[#allocation32_spill] sm:$0xff] %v4575_v26  ;;  %1215 = vmatmul.f32.gmra.mxu2 %v5682_v27  ;;  %1989 = vmatpush.msrb.mxu0 %v4585_v41  ;;  %v4591_v34 = vsub.f32 %v269_v21, %v4585_v41  ;;  %v5687_v21 = vld [vmem:[#allocation69_spill] sm:$0xff] }
 0x1ab   :  { %2462 = vmatpush.msra.mxu3 %v4585_v41 }
 0x1ac   :  { %v851_v14 = vpop.f32.mrf.mxu3  ;;  %v1093_v26 = vpop.f32.mrf.mxu1  ;;  %v5497_v27 = vand.u32 4294901760, %v4591_v34  ;;  %2334 = vmatpush.msra.mxu2 %v4591_v34 }
 0x1ad   :  { %v717_v37 = vpop.f32.mrf.mxu2  ;;  %v988_v62 = vpop.f32.mrf.mxu0 }
 0x1ae   :  { %v718_v10 = vadd.f32 %v717_v37, %v592_v35  ;;  %v989_v15 = vadd.f32 %v988_v62, %v834_v48  ;;  %v2188_v48 = vsub.f32 %v4591_v34, %v5497_v27  ;;  %v266_v35 = vld [vmem:[#allocation5 + $0xd0] sm:$0xff] }
 0x1af   :  { %1668 = vmatmul.f32.gmra.mxu1 %v5683_v38  ;;  %v4607_v62 = vand.u32 4294901760, %v266_v35  ;;  %v5688_v38 = vld [vmem:[#allocation73_spill] sm:$0xff] }
 0x1b0   :  { %v4597_v53 = vadd.f32 %v1089_v1, %v989_v15  ;;  %1538 = vmatmul.f32.gmra.mxu0 %v5685_v43  ;;  %v846_v13 = vadd.f32 %v845_v39, %v718_v10  ;;  %v2189_v37 = vand.u32 4294901760, %v2188_v48  ;;  %v5689_v1 = vld [vmem:[#allocation72_spill] sm:$0xff]  ;;  %v5690_v48 = vld [vmem:[#allocation61_spill] sm:$0xff] }
 0x1b1   :  { %3010 = vmatmul.msk.f32.gmra.mxu3 %vm3992_vm14, %v5602_v17  ;;  %v596_v15 = vadd.f32 %v5689_v1, %v5688_v38  ;;  %1991 = vmatpush.msrb.mxu0 %v4607_v62  ;;  %v4613_v44 = vsub.f32 %v266_v35, %v4607_v62  ;;  %v5692_v1 = vld [vmem:[#allocation50_spill] sm:$0xff]  ;;  %v5694_v35 = vld [vmem:[#allocation71_spill] sm:$0xff]  ;;  %v5787_v63 = vld [vmem:[#allocation32_spill] sm:$0xff] }
 0x1b2   :  { %5684 = vst [vmem:[#allocation23_spill] sm:$0xff] %v4597_v53  ;;  %1223 = vmatmul.f32.gmra.mxu2 %v5687_v21  ;;  %2190 = vmatpush.msrb.mxu1 %v2189_v37 }
 0x1b3   :  { %2464 = vmatpush.msra.mxu3 %v4607_v62  ;;  %v5498_v21 = vand.u32 4294901760, %v4613_v44  ;;  %2337 = vmatpush.msra.mxu2 %v4613_v44 }
 0x1b4   :  { %v857_v53 = vpop.f32.mrf.mxu3  ;;  %v1097_v43 = vpop.f32.mrf.mxu1 }
 0x1b5   :  { %v722_v10 = vpop.f32.mrf.mxu2  ;;  %v992_v39 = vpop.f32.mrf.mxu0 }
 0x1b6   :  { %v723_v27 = vadd.f32 %v722_v10, %v596_v15  ;;  %v993_v8 = vadd.f32 %v992_v39, %v840_v30  ;;  %v2194_v30 = vsub.f32 %v4613_v44, %v5498_v21  ;;  %v263_v15 = vld [vmem:[#allocation5 + $0xb8] sm:$0xff]  ;;  %v5696_v21 = vld [vmem:[#allocation67_spill] sm:$0xff] }
 0x1b7   :  { %1674 = vmatmul.f32.gmra.mxu1 %v5690_v48  ;;  %v4629_v39 = vand.u32 4294901760, %v263_v15 }
 0x1b8   :  { %v4619_v38 = vadd.f32 %v1093_v26, %v993_v8  ;;  %1543 = vmatmul.f32.gmra.mxu0 %v5692_v1  ;;  %v852_v37 = vadd.f32 %v851_v14, %v723_v27  ;;  %v2195_v10 = vand.u32 4294901760, %v2194_v30  ;;  %v5695_v14 = vld [vmem:[#allocation74_spill] sm:$0xff] }
 0x1b9   :  { %3011 = vmatmul.msk.f32.gmra.mxu3 %vm3649_vm2, %v5602_v17  ;;  %1993 = vmatpush.msrb.mxu0 %v4629_v39  ;;  %v4633_v27 = vsub.f32 %v263_v15, %v4629_v39  ;;  %v260_v15 = vld [vmem:[#allocation5 + $0xa0] sm:$0xff]  ;;  %v5790_v23 = vld [vmem:[#allocation23_spill] sm:$0xff] }
 0x1ba   :  { %5691 = vst [vmem:[#allocation82_spill] sm:$0xff] %v4619_v38  ;;  %1231 = vmatmul.f32.gmra.mxu2 %v5694_v35  ;;  %2196 = vmatpush.msrb.mxu1 %v2195_v10 }
 0x1bb   :  { %2466 = vmatpush.msra.mxu3 %v4629_v39  ;;  %v5501_v30 = vand.u32 4294901760, %v4633_v27  ;;  %2340 = vmatpush.msra.mxu2 %v4633_v27 }
 0x1bc   :  { %v863_v48 = vpop.f32.mrf.mxu3  ;;  %v1101_v8 = vpop.f32.mrf.mxu1 }
 0x1bd   :  { %v727_v26 = vpop.f32.mrf.mxu2  ;;  %v996_v38 = vpop.f32.mrf.mxu0 }
 0x1be   :  { %v728_v1 = vadd.f32 %v727_v26, %v5695_v14  ;;  %v997_v40 = vadd.f32 %v996_v38, %v846_v13  ;;  %v2200_v13 = vsub.f32 %v4633_v27, %v5501_v30  ;;  %v5699_v38 = vld [vmem:[#allocation21_spill] sm:$0xff]  ;;  %v4650_v14 = vand.u32 4294901760, %v260_v15  ;;  %v5701_v30 = vld [vmem:[#allocation70_spill] sm:$0xff] }
 0x1bf   :  { %1680 = vmatmul.f32.gmra.mxu1 %v5696_v21 }
 0x1c0   :  { %v4640_v35 = vadd.f32 %v1097_v43, %v997_v40  ;;  %1548 = vmatmul.f32.gmra.mxu0 %v5698_v25  ;;  %v858_v10 = vadd.f32 %v857_v53, %v728_v1  ;;  %v2201_v26 = vand.u32 4294901760, %v2200_v13  ;;  %v4654_v53 = vsub.f32 %v260_v15, %v4650_v14  ;;  %v5700_v1 = vld [vmem:[#allocation76_spill] sm:$0xff]  ;;  %2468 = vmatpush.msra.mxu3 %v4650_v14  ;;  %v257_v15 = vld [vmem:[#allocation5 + $0x88] sm:$0xff] }
 0x1c1   :  { %3012 = vmatmul.msk.f32.gmra.mxu3 %vm3703_vm4, %v5602_v17  ;;  %1995 = vmatpush.msrb.mxu0 %v4650_v14  ;;  %v5793_v50 = vld [vmem:[#allocation82_spill] sm:$0xff] }
 0x1c2   :  { %5697 = vst [vmem:[#allocation77_spill] sm:$0xff] %v4640_v35  ;;  %1239 = vmatmul.f32.gmra.mxu2 %v5699_v38  ;;  %2202 = vmatpush.msrb.mxu1 %v2201_v26  ;;  %v5504_v13 = vand.u32 4294901760, %v4654_v53 }
 0x1c3   :  { %2343 = vmatpush.msra.mxu2 %v4654_v53 }
 0x1c4   :  { %v869_v21 = vpop.f32.mrf.mxu3  ;;  %v1105_v40 = vpop.f32.mrf.mxu1 }
 0x1c5   :  { %v732_v43 = vpop.f32.mrf.mxu2  ;;  %v1000_v35 = vpop.f32.mrf.mxu0 }
 0x1c6   :  { %v733_v25 = vadd.f32 %v732_v43, %v5700_v1  ;;  %v1001_v56 = vadd.f32 %v1000_v35, %v852_v37  ;;  %v2206_v37 = vsub.f32 %v4654_v53, %v5504_v13  ;;  %v5704_v35 = vld [vmem:[#allocation29_spill] sm:$0xff]  ;;  %v4671_v1 = vand.u32 4294901760, %v257_v15  ;;  %v5706_v13 = vld [vmem:[#allocation18_spill] sm:$0xff] }
 0x1c7   :  { %1686 = vmatmul.f32.gmra.mxu1 %v5701_v30 }
 0x1c8   :  { %v4661_v38 = vadd.f32 %v1101_v8, %v1001_v56  ;;  %1553 = vmatmul.f32.gmra.mxu0 %v5703_v4  ;;  %v864_v26 = vadd.f32 %v863_v48, %v733_v25  ;;  %v2207_v43 = vand.u32 4294901760, %v2206_v37  ;;  %v4675_v25 = vsub.f32 %v257_v15, %v4671_v1  ;;  %v5705_v48 = vld [vmem:[#allocation78_spill] sm:$0xff]  ;;  %2470 = vmatpush.msra.mxu3 %v4671_v1  ;;  %v254_v15 = vld [vmem:[#allocation5 + $0x70] sm:$0xff] }
 0x1c9   :  { %3013 = vmatmul.msk.f32.gmra.mxu3 %vm3696_vm3, %v5602_v17  ;;  %1997 = vmatpush.msrb.mxu0 %v4671_v1 }
 0x1ca   :  { %5702 = vst [vmem:[#allocation34_spill] sm:$0xff] %v4661_v38  ;;  %1247 = vmatmul.f32.gmra.mxu2 %v5704_v35  ;;  %2208 = vmatpush.msrb.mxu1 %v2207_v43  ;;  %v5507_v37 = vand.u32 4294901760, %v4675_v25 }
 0x1cb   :  { %2346 = vmatpush.msra.mxu2 %v4675_v25 }
 0x1cc   :  { %v875_v30 = vpop.f32.mrf.mxu3  ;;  %v1109_v56 = vpop.f32.mrf.mxu1 }
 0x1cd   :  { %v737_v8 = vpop.f32.mrf.mxu2  ;;  %v1004_v38 = vpop.f32.mrf.mxu0 }
 0x1ce   :  { %v738_v4 = vadd.f32 %v737_v8, %v5705_v48  ;;  %v1005_v49 = vadd.f32 %v1004_v38, %v858_v10  ;;  %v2212_v10 = vsub.f32 %v4675_v25, %v5507_v37  ;;  %v5709_v38 = vld [vmem:[#allocation33_spill] sm:$0xff]  ;;  %v4692_v48 = vand.u32 4294901760, %v254_v15  ;;  %v5711_v37 = vld [vmem:[#allocation26_spill] sm:$0xff] }
 0x1cf   :  { %1692 = vmatmul.f32.gmra.mxu1 %v5706_v13 }
 0x1d0   :  { %v4682_v35 = vadd.f32 %v1105_v40, %v1005_v49  ;;  %1558 = vmatmul.f32.gmra.mxu0 %v5708_v54  ;;  %v870_v43 = vadd.f32 %v869_v21, %v738_v4  ;;  %v2213_v8 = vand.u32 4294901760, %v2212_v10  ;;  %v4696_v4 = vsub.f32 %v254_v15, %v4692_v48  ;;  %v5710_v21 = vld [vmem:[#allocation80_spill] sm:$0xff]  ;;  %2472 = vmatpush.msra.mxu3 %v4692_v48 }
 0x1d1   :  { %3014 = vmatmul.msk.f32.gmra.mxu3 %vm3725_vm5, %v5602_v17  ;;  %1999 = vmatpush.msrb.mxu0 %v4692_v48 }
 0x1d2   :  { %5707 = vst [vmem:[#allocation81_spill] sm:$0xff] %v4682_v35  ;;  %1255 = vmatmul.f32.gmra.mxu2 %v5709_v38  ;;  %2214 = vmatpush.msrb.mxu1 %v2213_v8  ;;  %v5508_v10 = vand.u32 4294901760, %v4696_v4  ;;  %v5713_v38 = vld [vmem:[#allocation16_spill] sm:$0xff] }
 0x1d3   :  { %2349 = vmatpush.msra.mxu2 %v4696_v4 }
 0x1d4   :  { %v881_v13 = vpop.f32.mrf.mxu3  ;;  %v1113_v49 = vpop.f32.mrf.mxu1 }
 0x1d5   :  { %v742_v40 = vpop.f32.mrf.mxu2  ;;  %v1008_v35 = vpop.f32.mrf.mxu0 }
 0x1d6   :  { %v743_v54 = vadd.f32 %v742_v40, %v5710_v21  ;;  %v1009_v6 = vadd.f32 %v1008_v35, %v864_v26  ;;  %v2218_v26 = vsub.f32 %v4696_v4, %v5508_v10  ;;  %v5714_v35 = vld [vmem:[#allocation43_spill] sm:$0xff] }
 0x1d7   :  { %1698 = vmatmul.f32.gmra.mxu1 %v5711_v37  ;;  %v251_v37 = vld [vmem:[#allocation5 + $0x58] sm:$0xff] }
 0x1d8   :  { %v4703_v13 = vadd.f32 %v1109_v56, %v1009_v6  ;;  %1563 = vmatmul.f32.gmra.mxu0 %v5713_v38  ;;  %v876_v8 = vadd.f32 %v875_v30, %v743_v54  ;;  %v2219_v15 = vand.u32 4294901760, %v2218_v26  ;;  %v4713_v56 = vand.u32 4294901760, %v251_v37  ;;  %v5715_v30 = vld [vmem:[#allocation30_spill] sm:$0xff]  ;;  %v5717_v38 = vld [vmem:[#allocation25_spill] sm:$0xff] }
 0x1d9   :  { %3015 = vmatmul.msk.f32.gmra.mxu3 %vm3753_vm7, %v5602_v17 }
 0x1da   :  { %5712 = vst [vmem:[#allocation38_spill] sm:$0xff] %v4703_v13  ;;  %1263 = vmatmul.f32.gmra.mxu2 %v5714_v35  ;;  %2220 = vmatpush.msrb.mxu1 %v2219_v15  ;;  %v4718_v13 = vsub.f32 %v251_v37, %v4713_v56 }
 0x1db   :  { %2001 = vmatpush.msrb.mxu0 %v4713_v56  ;;  %2474 = vmatpush.msra.mxu3 %v4713_v56 }
 0x1dc   :  { %v886_v40 = vpop.f32.mrf.mxu3  ;;  %v1117_v21 = vpop.f32.mrf.mxu1  ;;  %2352 = vmatpush.msra.mxu2 %v4718_v13 }
 0x1dd   :  { %v747_v22 = vpop.f32.mrf.mxu2  ;;  %v1012_v6 = vpop.f32.mrf.mxu0 }
 0x1de   :  { %v1013_v54 = vadd.f32 %v1012_v6, %v870_v43  ;;  %v5511_v22 = vand.u32 4294901760, %v4718_v13  ;;  %v5718_v43 = vld [vmem:[#allocation49_spill] sm:$0xff] }
 0x1df   :  { %1704 = vmatmul.f32.gmra.mxu1 %v5715_v30  ;;  %v5719_v30 = vld [vmem:[#allocation36_spill] sm:$0xff] }
 0x1e0   :  { %v4720_v10 = vadd.f32 %v1113_v49, %v1013_v54  ;;  %1568 = vmatmul.f32.gmra.mxu0 %v5717_v38  ;;  %v2224_v37 = vsub.f32 %v4718_v13, %v5511_v22  ;;  %v248_v54 = vld [vmem:[#allocation5 + $0x40] sm:$0xff] }
 0x1e1   :  { %3016 = vmatmul.msk.f32.gmra.mxu3 %vm3808_vm10, %v5602_v17  ;;  %v4733_v38 = vand.u32 4294901760, %v248_v54 }
 0x1e2   :  { %5716 = vst [vmem:[#allocation73_spill] sm:$0xff] %v4720_v10  ;;  %1271 = vmatmul.f32.gmra.mxu2 %v5718_v43  ;;  %v2225_v6 = vand.u32 4294901760, %v2224_v37  ;;  %v245_v37 = vld [vmem:[#allocation5 + $0x28] sm:$0xff] }
 0x1e3   :  { %v4740_v43 = vsub.f32 %v248_v54, %v4733_v38  ;;  %2003 = vmatpush.msrb.mxu0 %v4733_v38  ;;  %2476 = vmatpush.msra.mxu3 %v4733_v38 }
 0x1e4   :  { %v891_v49 = vpop.f32.mrf.mxu3  ;;  %v1121_v26 = vpop.f32.mrf.mxu1  ;;  %2226 = vmatpush.msrb.mxu1 %v2225_v6 }
 0x1e5   :  { %v751_v15 = vpop.f32.mrf.mxu2  ;;  %v1016_v40 = vpop.f32.mrf.mxu0  ;;  %v5513_v49 = vand.u32 4294901760, %v4740_v43  ;;  %v4748_v26 = vand.u32 4294901760, %v245_v37  ;;  %2355 = vmatpush.msra.mxu2 %v4740_v43 }
 0x1e6   :  { %v1017_v10 = vadd.f32 %v1016_v40, %v876_v8  ;;  %v5722_v8 = vld [vmem:[#allocation54_spill] sm:$0xff] }
 0x1e7   :  { %1710 = vmatmul.f32.gmra.mxu1 %v5719_v30  ;;  %v2230_v40 = vsub.f32 %v4740_v43, %v5513_v49  ;;  %2005 = vmatpush.msrb.mxu0 %v4748_v26  ;;  %v4757_v6 = vsub.f32 %v245_v37, %v4748_v26  ;;  %v5724_v37 = vand.u32 4294901760, %v4441_v29 }
 0x1e8   :  { %v4736_v35 = vadd.f32 %v1117_v21, %v1017_v10  ;;  %1573 = vmatmul.f32.gmra.mxu0 %v5721_v7  ;;  %v242_v10 = vld [vmem:[#allocation5 + $0x10] sm:$0xff]  ;;  %2478 = vmatpush.msra.mxu3 %v4748_v26 }
 0x1e9   :  { %3017 = vmatmul.msk.f32.gmra.mxu3 %vm3881_vm13, %v5602_v17  ;;  %v4759_v54 = vand.u32 4294901760, %v242_v10  ;;  %v2231_v7 = vand.u32 4294901760, %v2230_v40  ;;  %v5512_v30 = vand.u32 4294901760, %v4757_v6  ;;  %v5726_v40 = vld [vmem:[#allocation57_spill] sm:$0xff]  ;;  %2358 = vmatpush.msra.mxu2 %v4757_v6 }
 0x1ea   :  { %5720 = vst [vmem:[#allocation72_spill] sm:$0xff] %v4736_v35  ;;  %1279 = vmatmul.f32.gmra.mxu2 %v5722_v8 }
 0x1eb   :  { %2007 = vmatpush.msrb.mxu0 %v4759_v54  ;;  %2480 = vmatpush.msra.mxu3 %v4759_v54 }
 0x1ec   :  { %v896_v21 = vpop.f32.mrf.mxu3  ;;  %v1124_v15 = vpop.f32.mrf.mxu1  ;;  %2232 = vmatpush.msrb.mxu1 %v2231_v7  ;;  %v5727_v7 = vand.u32 4294901760, %v4491_v59  ;;  %v5730_v59 = vand.u32 4294901760, %v4569_v3  ;;  %v5734_v3 = vand.u32 4294901760, %v4633_v27 }
 0x1ed   :  { %v755_v22 = vpop.f32.mrf.mxu2  ;;  %v1020_v35 = vpop.f32.mrf.mxu0  ;;  %v4764_v21 = vsub.f32 %v242_v10, %v4759_v54  ;;  %v5723_v15 = vld [vmem:[#allocation44_spill] sm:$0xff]  ;;  %2589 = vmatpush.msra.mxu0 %v5724_v37  ;;  %v5725_v10 = vand.u32 4294901760, %v4465_v36  ;;  %v5729_v36 = vand.u32 4294901760, %v4546_v24 }
 0x1ee   :  { %v2236_v35 = vsub.f32 %v4757_v6, %v5512_v30 }
 0x1ef   :  { %1716 = vmatmul.f32.gmra.mxu1 %v5723_v15  ;;  %v2241_v22 = vand.u32 4294901760, %v4764_v21  ;;  %2593 = vmatpush.msra.mxu0 %v5725_v10 }
 0x1f0   :  { %1578 = vmatmul.f32.gmra.mxu0 %v3745_v33  ;;  %v2237_v29 = vand.u32 4294901760, %v2236_v35  ;;  %2361 = vmatpush.msra.mxu2 %v4764_v21 }
 0x1f1   :  { %3018 = vmatmul.msk.f32.gmra.mxu3 %vm5646_vm1, %v5602_v17  ;;  %v2242_v37 = vsub.f32 %v4764_v21, %v2241_v22  ;;  %2597 = vmatpush.msra.mxu0 %v5727_v7  ;;  %vm5741_vm1 = vnez %v5647_v32  ;;  %v5784_v32 = vld [vmem:[#allocation56_spill] sm:$0xff] }
 0x1f2   :  { %1287 = vmatmul.f32.gmra.mxu2 %v5726_v40  ;;  %2238 = vmatpush.msrb.mxu1 %v2237_v29 }
 0x1f3   :  { %v2243_v33 = vand.u32 4294901760, %v2242_v37  ;;  %2601 = vmatpush.msra.mxu0 %v5728_v60  ;;  %v5731_v60 = vld [vmem:[#allocation59_spill] sm:$0xff] }
 0x1f4   :  { %v1127_v30 = vpop.f32.mrf.mxu1  ;;  %v1403_v49 = vpop.f32.mrf.mxu3 }
 0x1f5   :  { %v759_v15 = vpop.f32.mrf.mxu2  ;;  %v1023_v8 = vpop.f32.mrf.mxu0  ;;  %2244 = vmatpush.msrb.mxu1 %v2243_v33  ;;  %2605 = vmatpush.msra.mxu0 %v5729_v36  ;;  %v5732_v33 = vand.u32 4294901760, %v4591_v34  ;;  %v5739_v49 = vand.u32 4294901760, %v4696_v4 }
 0x1f6   :  { %v5733_v8 = vand.u32 4294901760, %v4613_v44  ;;  %v5738_v44 = vand.u32 4294901760, %v4675_v25 }
 0x1f7   :  { %1722 = vmatmul.f32.gmra.mxu1 %v3860_v12  ;;  %2609 = vmatpush.msra.mxu0 %v5730_v59  ;;  %v5796_v59 = vld [vmem:[#allocation77_spill] sm:$0xff] }
 0x1f8   :  { %1583 = vmatmul.f32.gmra.mxu0 %v3802_v61  ;;  %2720 = vmatpush.msra.mxu1 %v4433_v20 }
 0x1f9   :  { %3019 = vmatmul.msk.f32.gmra.mxu3 %vm5652_vm0, %v5602_v17  ;;  %2613 = vmatpush.msra.mxu0 %v5732_v33  ;;  %vm5735_vm0 = vnez %v5526_v5 }
 0x1fa   :  { %1295 = vmatmul.f32.gmra.mxu2 %v5731_v60  ;;  %2722 = vmatpush.msra.mxu1 %v4458_v11  ;;  %v5736_v11 = vand.u32 4294901760, %v4654_v53  ;;  %v5740_v53 = vand.u32 4294901760, %v4718_v13 }
 0x1fb   :  { %2617 = vmatpush.msra.mxu0 %v5733_v8 }
 0x1fc   :  { %v1130_v2 = vpop.f32.mrf.mxu1  ;;  %v1406_v24 = vpop.f32.mrf.mxu3  ;;  %2724 = vmatpush.msra.mxu1 %v4485_v51  ;;  %v5737_v51 = vld [vmem:[#allocation63_spill] sm:$0xff] }
 0x1fd   :  { %v1026_v30 = vpop.f32.mrf.mxu0  ;;  %v1170_v20 = vpop.f32.mrf.mxu2  ;;  %2621 = vmatpush.msra.mxu0 %v5734_v3 }
 0x1fe   :  { %2726 = vmatpush.msra.mxu1 %v4509_v9 }
 0x1ff   :  { %1728 = vmatmul.f32.gmra.mxu1 %v3906_v18  ;;  %2625 = vmatpush.msra.mxu0 %v5736_v11  ;;  %v5799_v11 = vld [vmem:[#allocation34_spill] sm:$0xff] }
 0x200   :  { %1588 = vmatmul.f32.gmra.mxu0 %v3846_v55  ;;  %2728 = vmatpush.msra.mxu1 %v4530_v42 }
 0x201   :  { %3038 = vmatmul.msk.f32.vlgmr.msrb.gmra.mxu3 %vm5735_vm0, %v5602_v17  ;;  %2629 = vmatpush.msra.mxu0 %v5738_v44 }
 0x202   :  { %1302 = vmatmul.f32.gmra.mxu2 %v5737_v51  ;;  %2730 = vmatpush.msra.mxu1 %v4563_v52  ;;  %v5742_v52 = vand.u32 4294901760, %v4740_v43 }
 0x203   :  { %2633 = vmatpush.msra.mxu0 %v5739_v49 }
 0x204   :  { %v1409_v9 = vpop.f32.mrf.mxu3  ;;  %v1641_v34 = vpop.f32.mrf.mxu1  ;;  %2732 = vmatpush.msra.mxu1 %v4585_v41  ;;  %v5743_v41 = vand.u32 4294901760, %v4757_v6 }
 0x205   :  { %v1029_v27 = vpop.f32.mrf.mxu0  ;;  %v1177_v42 = vpop.f32.mrf.mxu2  ;;  %2637 = vmatpush.msra.mxu0 %v5740_v53  ;;  %v5747_v53 = vld [vmem:[#allocation47_spill] sm:$0xff] }
 0x206   :  { %2734 = vmatpush.msra.mxu1 %v4607_v62 }
 0x207   :  { %1734 = vmatmul.f32.gmra.mxu1 %v3920_v46  ;;  %2641 = vmatpush.msra.mxu0 %v5742_v52 }
 0x208   :  { %1593 = vmatmul.f32.gmra.mxu0 %v3897_v16  ;;  %2736 = vmatpush.msra.mxu1 %v4629_v39 }
 0x209   :  { %3039 = vmatmul.msk.f32.gmra.mxu3 %vm5741_vm1, %v5602_v17  ;;  %2645 = vmatpush.msra.mxu0 %v5743_v41  ;;  %v5803_v41 = vld [vmem:[#allocation81_spill] sm:$0xff] }
 0x20a   :  { %3020 = vmatmul.msk.f32.vlgmr.msrb.gmra.mxu2 %vm5735_vm0, %v5602_v17  ;;  %2738 = vmatpush.msra.mxu1 %v4650_v14 }
 0x20b   :  { %2649 = vmatpush.msra.mxu0 %v2241_v22 }
 0x20c   :  { %v1413_v62 = vpop.f32.mrf.mxu3  ;;  %v1646_v25 = vpop.f32.mrf.mxu1  ;;  %2740 = vmatpush.msra.mxu1 %v4671_v1 }
 0x20d   :  { %v1184_v39 = vpop.f32.mrf.mxu2  ;;  %v1521_v4 = vpop.f32.mrf.mxu0 }
 0x20e   :  { %v1410_v13 = vadd.f32 %v1409_v9, %v1184_v39  ;;  %2742 = vmatpush.msra.mxu1 %v4692_v48 }
 0x20f   :  { %1739 = vmatmul.f32.gmra.mxu1 %v3960_v57 }
 0x210   :  { %1598 = vmatmul.f32.gmra.mxu0 %v3908_v31  ;;  %2744 = vmatpush.msra.mxu1 %v4713_v56 }
 0x211   :  { %3040 = vmatmul.msk.f32.gmra.mxu3 %vm3748_vm6, %v5602_v17 }
 0x212   :  { %3021 = vmatmul.msk.f32.gmra.mxu2 %vm5741_vm1, %v5602_v17  ;;  %2746 = vmatpush.msra.mxu1 %v4733_v38 }
 0x214   :  { %v1417_v14 = vpop.f32.mrf.mxu3  ;;  %v1651_v1 = vpop.f32.mrf.mxu1  ;;  %2748 = vmatpush.msra.mxu1 %v4748_v26 }
 0x215   :  { %v1192_v48 = vpop.f32.mrf.mxu2  ;;  %v1525_v43 = vpop.f32.mrf.mxu0 }
 0x216   :  { %v1414_v6 = vadd.f32 %v1413_v62, %v1192_v48  ;;  %2750 = vmatpush.msra.mxu1 %v4759_v54 }
 0x217   :  { %3056 = vmatmul.msk.f32.vlgmr.msrb.gmra.mxu1 %vm5735_vm0, %v5602_v17 }
 0x218   :  { %1602 = vmatmul.f32.gmra.mxu0 %v3936_v58 }
 0x219   :  { %3041 = vmatmul.msk.f32.gmra.mxu3 %vm3766_vm8, %v5602_v17 }
 0x21a   :  { %3022 = vmatmul.msk.f32.gmra.mxu2 %vm3748_vm6, %v5602_v17 }
 0x21c   :  { %v1421_v38 = vpop.f32.mrf.mxu3  ;;  %v1657_v56 = vpop.f32.mrf.mxu1 }
 0x21d   :  { %v1200_v26 = vpop.f32.mrf.mxu2  ;;  %v1529_v21 = vpop.f32.mrf.mxu0 }
 0x21e   :  { %v1418_v15 = vadd.f32 %v1417_v14, %v1200_v26  ;;  %v1530_v54 = vadd.f32 %v1529_v21, %v1410_v13 }
 0x21f   :  { %3057 = vmatmul.msk.f32.gmra.mxu1 %vm5741_vm1, %v5602_v17 }
 0x220   :  { %2013 = vmatmul.f32.vlgmr.msrb.gmra.mxu0 %v5648_v19  ;;  %v4869_v35 = vadd.f32 %v1651_v1, %v1530_v54  ;;  %v5749_v1 = vld [vmem:[#allocation51_spill] sm:$0xff] }
 0x221   :  { %3042 = vmatmul.msk.f32.gmra.mxu3 %vm3789_vm9, %v5602_v17  ;;  %v5751_v54 = vld [vmem:[#allocation55_spill] sm:$0xff] }
 0x222   :  { %3023 = vmatmul.msk.f32.gmra.mxu2 %vm3766_vm8, %v5602_v17 }
 0x224   :  { %v1425_v22 = vpop.f32.mrf.mxu3  ;;  %v1663_v10 = vpop.f32.mrf.mxu1 }
 0x225   :  { %v1208_v29 = vpop.f32.mrf.mxu2  ;;  %v1534_v37 = vpop.f32.mrf.mxu0 }
 0x226   :  { %v1422_v7 = vadd.f32 %v1421_v38, %v1208_v29  ;;  %v1535_v36 = vadd.f32 %v1534_v37, %v1414_v6 }
 0x227   :  { %3058 = vmatmul.msk.f32.gmra.mxu1 %vm3748_vm6, %v5602_v17 }
 0x228   :  { %2020 = vmatmul.f32.gmra.mxu0 %v5655_v47  ;;  %v4881_v19 = vadd.f32 %v1657_v56, %v1535_v36  ;;  %v5745_v47 = vld [vmem:[#allocation42_spill] sm:$0xff] }
 0x229   :  { %3043 = vmatmul.msk.f32.gmra.mxu3 %vm3835_vm11, %v5602_v17 }
 0x22a   :  { %3024 = vmatmul.msk.f32.gmra.mxu2 %vm3789_vm9, %v5602_v17 }
 0x22c   :  { %v1429_v33 = vpop.f32.mrf.mxu3  ;;  %v1669_v2 = vpop.f32.mrf.mxu1 }
 0x22d   :  { %v1216_v24 = vpop.f32.mrf.mxu2  ;;  %v1539_v30 = vpop.f32.mrf.mxu0 }
 0x22e   :  { %v1426_v20 = vadd.f32 %v1425_v22, %v1216_v24  ;;  %v1540_v8 = vadd.f32 %v1539_v30, %v1418_v15  ;;  %v5753_v24 = vld [vmem:[#allocation62_spill] sm:$0xff] }
 0x22f   :  { %3059 = vmatmul.msk.f32.gmra.mxu1 %vm3766_vm8, %v5602_v17 }
 0x230   :  { %2027 = vmatmul.f32.gmra.mxu0 %v5745_v47  ;;  %v4893_v3 = vadd.f32 %v1663_v10, %v1540_v8  ;;  %v5810_v10 = vld [vmem:[#allocation73_spill] sm:$0xff] }
 0x231   :  { %3044 = vmatmul.msk.f32.gmra.mxu3 %vm3944_vm15, %v5602_v17 }
 0x232   :  { %3025 = vmatmul.msk.f32.gmra.mxu2 %vm3835_vm11, %v5602_v17 }
 0x234   :  { %v1433_v44 = vpop.f32.mrf.mxu3  ;;  %v1675_v9 = vpop.f32.mrf.mxu1 }
 0x235   :  { %v1224_v34 = vpop.f32.mrf.mxu2  ;;  %v1544_v27 = vpop.f32.mrf.mxu0 }
 0x236   :  { %v1430_v42 = vadd.f32 %v1429_v33, %v1224_v34  ;;  %v1545_v49 = vadd.f32 %v1544_v27, %v1422_v7 }
 0x237   :  { %3060 = vmatmul.msk.f32.gmra.mxu1 %vm3789_vm9, %v5602_v17 }
 0x238   :  { %2034 = vmatmul.f32.gmra.mxu0 %v5747_v53  ;;  %v4905_v52 = vadd.f32 %v1669_v2, %v1545_v49 }
 0x239   :  { %3045 = vmatmul.msk.f32.gmra.mxu3 %vm3999_vm12, %v5602_v17 }
 0x23a   :  { %3026 = vmatmul.msk.f32.gmra.mxu2 %vm3944_vm15, %v5602_v17 }
 0x23c   :  { %v1437_v62 = vpop.f32.mrf.mxu3  ;;  %v1681_v25 = vpop.f32.mrf.mxu1 }
 0x23d   :  { %v1232_v39 = vpop.f32.mrf.mxu2  ;;  %v1549_v4 = vpop.f32.mrf.mxu0 }
 0x23e   :  { %v1434_v13 = vadd.f32 %v1433_v44, %v1232_v39  ;;  %v1550_v14 = vadd.f32 %v1549_v4, %v1426_v20  ;;  %v5812_v20 = vld [vmem:[#allocation72_spill] sm:$0xff] }
 0x23f   :  { %3061 = vmatmul.msk.f32.gmra.mxu1 %vm3835_vm11, %v5602_v17 }
 0x240   :  { %2041 = vmatmul.f32.gmra.mxu0 %v5749_v1  ;;  %v4917_v48 = vadd.f32 %v1675_v9, %v1550_v14  ;;  %v5757_v1 = vld [vmem:[#allocation71_spill] sm:$0xff] }
 0x241   :  { %3046 = vmatmul.msk.f32.gmra.mxu3 %vm3992_vm14, %v5602_v17 }
 0x242   :  { %3027 = vmatmul.msk.f32.gmra.mxu2 %vm3999_vm12, %v5602_v17 }
 0x244   :  { %v1441_v6 = vpop.f32.mrf.mxu3  ;;  %v1687_v38 = vpop.f32.mrf.mxu1 }
 0x245   :  { %v1240_v56 = vpop.f32.mrf.mxu2  ;;  %v1554_v26 = vpop.f32.mrf.mxu0 }
 0x246   :  { %v1438_v21 = vadd.f32 %v1437_v62, %v1240_v56  ;;  %v1555_v15 = vadd.f32 %v1554_v26, %v1430_v42  ;;  %v5755_v42 = vld [vmem:[#allocation69_spill] sm:$0xff] }
 0x247   :  { %3062 = vmatmul.msk.f32.gmra.mxu1 %vm3944_vm15, %v5602_v17 }
 0x248   :  { %2049 = vmatmul.f32.gmra.mxu0 %v5751_v54  ;;  %v4929_v22 = vadd.f32 %v1681_v25, %v1555_v15 }
 0x249   :  { %3047 = vmatmul.msk.f32.gmra.mxu3 %vm3649_vm2, %v5602_v17 }
 0x24a   :  { %3028 = vmatmul.msk.f32.gmra.mxu2 %vm3992_vm14, %v5602_v17 }
 0x24c   :  { %v1445_v29 = vpop.f32.mrf.mxu3  ;;  %v1693_v37 = vpop.f32.mrf.mxu1 }
 0x24d   :  { %v1248_v7 = vpop.f32.mrf.mxu2  ;;  %v1559_v36 = vpop.f32.mrf.mxu0 }
 0x24e   :  { %v1442_v33 = vadd.f32 %v1441_v6, %v1248_v7  ;;  %v1560_v2 = vadd.f32 %v1559_v36, %v1434_v13 }
 0x24f   :  { %3063 = vmatmul.msk.f32.gmra.mxu1 %vm3999_vm12, %v5602_v17 }
 0x250   :  { %2057 = vmatmul.f32.gmra.mxu0 %v5753_v24  ;;  %v4941_v30 = vadd.f32 %v1687_v38, %v1560_v2  ;;  %v5758_v38 = vld [vmem:[#allocation28_spill] sm:$0xff] }
 0x251   :  { %3048 = vmatmul.msk.f32.gmra.mxu3 %vm3703_vm4, %v5602_v17 }
 0x252   :  { %3029 = vmatmul.msk.f32.gmra.mxu2 %vm3649_vm2, %v5602_v17 }
 0x254   :  { %v1449_v8 = vpop.f32.mrf.mxu3  ;;  %v1699_v47 = vpop.f32.mrf.mxu1 }
 0x255   :  { %v1256_v44 = vpop.f32.mrf.mxu2  ;;  %v1564_v9 = vpop.f32.mrf.mxu0 }
 0x256   :  { %v1446_v34 = vadd.f32 %v1445_v29, %v1256_v44  ;;  %v1565_v27 = vadd.f32 %v1564_v9, %v1438_v21  ;;  %v5760_v44 = vld [vmem:[#allocation29_spill] sm:$0xff] }
 0x257   :  { %3064 = vmatmul.msk.f32.gmra.mxu1 %vm3992_vm14, %v5602_v17 }
 0x258   :  { %2065 = vmatmul.f32.gmra.mxu0 %v5755_v42  ;;  %v4953_v49 = vadd.f32 %v1693_v37, %v1565_v27  ;;  %v5759_v37 = vld [vmem:[#allocation21_spill] sm:$0xff] }
 0x259   :  { %3049 = vmatmul.msk.f32.gmra.mxu3 %vm3696_vm3, %v5602_v17 }
 0x25a   :  { %3030 = vmatmul.msk.f32.gmra.mxu2 %vm3703_vm4, %v5602_v17 }
 0x25c   :  { %v1453_v62 = vpop.f32.mrf.mxu3  ;;  %v1705_v25 = vpop.f32.mrf.mxu1 }
 0x25d   :  { %v1264_v39 = vpop.f32.mrf.mxu2  ;;  %v1569_v4 = vpop.f32.mrf.mxu0 }
 0x25e   :  { %v1450_v13 = vadd.f32 %v1449_v8, %v1264_v39  ;;  %v1570_v14 = vadd.f32 %v1569_v4, %v1442_v33 }
 0x25f   :  { %3065 = vmatmul.msk.f32.gmra.mxu1 %vm3649_vm2, %v5602_v17 }
 0x260   :  { %2073 = vmatmul.f32.gmra.mxu0 %v5757_v1  ;;  %v4965_v6 = vadd.f32 %v1699_v47, %v1570_v14 }
 0x261   :  { %3050 = vmatmul.msk.f32.gmra.mxu3 %vm3725_vm5, %v5602_v17 }
 0x262   :  { %3031 = vmatmul.msk.f32.gmra.mxu2 %vm3696_vm3, %v5602_v17 }
 0x264   :  { %v1457_v56 = vpop.f32.mrf.mxu3  ;;  %v1711_v26 = vpop.f32.mrf.mxu1 }
 0x265   :  { %v1272_v21 = vpop.f32.mrf.mxu2  ;;  %v1574_v15 = vpop.f32.mrf.mxu0 }
 0x266   :  { %v1454_v54 = vadd.f32 %v1453_v62, %v1272_v21  ;;  %v1575_v29 = vadd.f32 %v1574_v15, %v1446_v34 }
 0x267   :  { %3066 = vmatmul.msk.f32.gmra.mxu1 %vm3703_vm4, %v5602_v17 }
 0x268   :  { %2081 = vmatmul.f32.gmra.mxu0 %v5759_v37  ;;  %v4977_v7 = vadd.f32 %v1705_v25, %v1575_v29  ;;  %v5764_v37 = vld [vmem:[#allocation52_spill] sm:$0xff] }
 0x269   :  { %3051 = vmatmul.msk.f32.gmra.mxu3 %vm3753_vm7, %v5602_v17 }
 0x26a   :  { %3032 = vmatmul.msk.f32.gmra.mxu2 %vm3725_vm5, %v5602_v17 }
 0x26c   :  { %v1461_v36 = vpop.f32.mrf.mxu3  ;;  %v1717_v33 = vpop.f32.mrf.mxu1 }
 0x26d   :  { %v1280_v2 = vpop.f32.mrf.mxu2  ;;  %v1579_v24 = vpop.f32.mrf.mxu0 }
 0x26e   :  { %v1458_v8 = vadd.f32 %v1457_v56, %v1280_v2  ;;  %v1580_v47 = vadd.f32 %v1579_v24, %v1450_v13  ;;  %v5762_v13 = vld [vmem:[#allocation33_spill] sm:$0xff] }
 0x26f   :  { %3067 = vmatmul.msk.f32.gmra.mxu1 %vm3696_vm3, %v5602_v17 }
 0x270   :  { %2089 = vmatmul.f32.gmra.mxu0 %v5760_v44  ;;  %v4989_v9 = vadd.f32 %v1711_v26, %v1580_v47  ;;  %v5766_v47 = vld [vmem:[#allocation49_spill] sm:$0xff] }
 0x271   :  { %3052 = vmatmul.msk.f32.gmra.mxu3 %vm3808_vm10, %v5602_v17 }
 0x272   :  { %3033 = vmatmul.msk.f32.gmra.mxu2 %vm3753_vm7, %v5602_v17 }
 0x274   :  { %v1465_v27 = vpop.f32.mrf.mxu3  ;;  %v1723_v42 = vpop.f32.mrf.mxu1 }
 0x275   :  { %v1288_v62 = vpop.f32.mrf.mxu2  ;;  %v1584_v25 = vpop.f32.mrf.mxu0 }
 0x276   :  { %v1462_v39 = vadd.f32 %v1461_v36, %v1288_v62  ;;  %v1585_v4 = vadd.f32 %v1584_v25, %v1454_v54  ;;  %v5763_v54 = vld [vmem:[#allocation43_spill] sm:$0xff] }
 0x277   :  { %3068 = vmatmul.msk.f32.gmra.mxu1 %vm3725_vm5, %v5602_v17  ;;  %vm5765_vm5 = vnez %v5764_v37 }
 0x278   :  { %2097 = vmatmul.f32.gmra.mxu0 %v5762_v13  ;;  %v5001_v14 = vadd.f32 %v1717_v33, %v1585_v4  ;;  %v5769_v4 = vld [vmem:[#allocation15_spill] sm:$0xff] }
 0x279   :  { %3053 = vmatmul.msk.f32.gmra.mxu3 %vm3881_vm13, %v5602_v17 }
 0x27a   :  { %3034 = vmatmul.msk.f32.gmra.mxu2 %vm3808_vm10, %v5602_v17 }
 0x27c   :  { %v1468_v1 = vpop.f32.mrf.mxu3  ;;  %v1729_v56 = vpop.f32.mrf.mxu1 }
 0x27d   :  { %v1296_v26 = vpop.f32.mrf.mxu2  ;;  %v1589_v21 = vpop.f32.mrf.mxu0 }
 0x27e   :  { %v1590_v15 = vadd.f32 %v1589_v21, %v1458_v8  ;;  %v5770_v21 = vld [vmem:[#allocation20_spill] sm:$0xff] }
 0x27f   :  { %3069 = vmatmul.msk.f32.gmra.mxu1 %vm3753_vm7, %v5602_v17  ;;  %vm5767_vm7 = vnez %v5651_v0 }
 0x280   :  { %2105 = vmatmul.f32.gmra.mxu0 %v5763_v54  ;;  %v5013_v29 = vadd.f32 %v1723_v42, %v1590_v15  ;;  %v5771_v15 = vld [vmem:[#allocation14_spill] sm:$0xff]  ;;  %v3172_v54 = vld [vmem:[#allocation7] ss:$0 sm:$0xff] }
 0x281   :  { %3054 = vmatmul.msk.f32.gmra.mxu3 %vm5765_vm5, %v5602_v17 }
 0x282   :  { %3035 = vmatmul.msk.f32.gmra.mxu2 %vm3881_vm13, %v5602_v17 }
 0x284   :  { %v1735_v36 = vpop.f32.mrf.mxu1  ;;  %v1909_v33 = vpop.f32.mrf.mxu3 }
 0x285   :  { %v1303_v2 = vpop.f32.mrf.mxu2  ;;  %v1594_v24 = vpop.f32.mrf.mxu0 }
 0x286   :  { %v1595_v8 = vadd.f32 %v1594_v24, %v1462_v39  ;;  %v5768_v39 = vld [vmem:[#allocation54_spill] sm:$0xff] }
 0x287   :  { %3070 = vmatmul.msk.f32.gmra.mxu1 %vm3808_vm10, %v5602_v17 }
 0x288   :  { %2113 = vmatmul.f32.gmra.mxu0 %v5766_v47  ;;  %v5025_v44 = vadd.f32 %v1729_v56, %v1595_v8  ;;  %v5772_v47 = vld [vmem:[#allocation12_spill] sm:$0xff] }
 0x289   :  { %3055 = vmatmul.msk.f32.gmra.mxu3 %vm5767_vm7, %v5602_v17 }
 0x28a   :  { %3036 = vmatmul.msk.f32.gmra.mxu2 %vm5765_vm5, %v5602_v17 }
 0x28c   :  { %v1740_v27 = vpop.f32.mrf.mxu1  ;;  %v1912_v42 = vpop.f32.mrf.mxu3 }
 0x28d   :  { %v1599_v62 = vpop.f32.mrf.mxu0  ;;  %v1808_v25 = vpop.f32.mrf.mxu2  ;;  %v2848_v27 = vadd.f32 %v3172_v54, %v5772_v47 }
 0x28e   :  { %v5774_v25 = vld [vmem:[#allocation17_spill] sm:$0xff] }
 0x28f   :  { %3071 = vmatmul.msk.f32.gmra.mxu1 %vm3881_vm13, %v5602_v17 }
 0x290   :  { %2121 = vmatmul.f32.gmra.mxu0 %v5768_v39 }
 0x291   :  { %2484 = vmatmul.f32.vlgmr.msra.gmra.mxu3 %v5769_v4 }
 0x292   :  { %3037 = vmatmul.msk.f32.gmra.mxu2 %vm5767_vm7, %v5602_v17 }
 0x294   :  { %v1915_v13 = vpop.f32.mrf.mxu3  ;;  %v2247_v1 = vpop.f32.mrf.mxu1 }
 0x295   :  { %v1603_v56 = vpop.f32.mrf.mxu0  ;;  %v1811_v26 = vpop.f32.mrf.mxu2 }
 0x296   :  { %v5775_v26 = vld [vmem:[#allocation19_spill] sm:$0xff] }
 0x297   :  { %3072 = vmatmul.msk.f32.gmra.mxu1 %vm5765_vm5, %v5602_v17 }
 0x298   :  { %2129 = vmatmul.f32.gmra.mxu0 %v5726_v40  ;;  %v5773_v40 = vld [vmem:[#allocation37_spill] sm:$0xff] }
 0x299   :  { %2489 = vmatmul.f32.gmra.mxu3 %v5770_v21 }
 0x29a   :  { %2364 = vmatmul.f32.vlgmr.msra.gmra.mxu2 %v5771_v15 }
 0x29c   :  { %v1919_v36 = vpop.f32.mrf.mxu3  ;;  %v2250_v33 = vpop.f32.mrf.mxu1 }
 0x29d   :  { %v1814_v2 = vpop.f32.mrf.mxu2  ;;  %v2014_v24 = vpop.f32.mrf.mxu0  ;;  %v5777_v33 = vld [vmem:[#allocation35_spill] sm:$0xff] }
 0x29e   :  { %v1815_v8 = vadd.f32 %v1814_v2, %v4869_v35  ;;  %v3173_v2 = vld [vmem:[#allocation7 + $0x1] ss:$0 sm:$0xff] }
 0x29f   :  { %3073 = vmatmul.msk.f32.gmra.mxu1 %vm5767_vm7, %v5602_v17 }
 0x2a0   :  { %v1916_v42 = vadd.f32 %v1915_v13, %v1815_v8  ;;  %2137 = vmatmul.f32.gmra.mxu0 %v5731_v60  ;;  %v2849_v13 = vadd.f32 %v3172_v54, %v5775_v26  ;;  %v5776_v60 = vld [vmem:[#allocation40_spill] sm:$0xff]  ;;  %v5778_v54 = vld [vmem:[#allocation79_spill] sm:$0xff] }
 0x2a1   :  { %2494 = vmatmul.f32.gmra.mxu3 %v5773_v40 }
 0x2a2   :  { %v5054_v62 = vadd.f32 %v2848_v27, %v1916_v42  ;;  %2368 = vmatmul.f32.gmra.mxu2 %v5774_v25  ;;  %v5779_v42 = vld [vmem:[#allocation48_spill] sm:$0xff]  ;;  %v5780_v25 = vld [vmem:[#allocation39_spill] sm:$0xff] }
 0x2a4   :  { %v1923_v39 = vpop.f32.mrf.mxu3  ;;  %v2253_v4 = vpop.f32.mrf.mxu1 }
 0x2a5   :  { %v1818_v1 = vpop.f32.mrf.mxu2  ;;  %v2021_v56 = vpop.f32.mrf.mxu0 }
 0x2a6   :  { %v1819_v35 = vadd.f32 %v1818_v1, %v4881_v19 }
 0x2a7   :  { %3092 = vmatmul.msk.f32.vlgmr.msra.gmra.mxu1 %vm5735_vm0, %v5602_v17 }
 0x2a8   :  { %v1920_v21 = vadd.f32 %v1919_v36, %v1819_v35  ;;  %2145 = vmatmul.f32.gmra.mxu0 %v5737_v51  ;;  %v2850_v36 = vadd.f32 %v3173_v2, %v5778_v54  ;;  %v5785_v54 = vld [vmem:[#allocation61_spill] sm:$0xff] }
 0x2a9   :  { %2499 = vmatmul.f32.gmra.mxu3 %v5776_v60  ;;  %v5783_v60 = vld [vmem:[#allocation45_spill] sm:$0xff] }
 0x2aa   :  { %v5064_v15 = vadd.f32 %v2849_v13, %v1920_v21  ;;  %2372 = vmatmul.f32.gmra.mxu2 %v5777_v33  ;;  %v5782_v13 = vld [vmem:[#allocation53_spill] sm:$0xff] }
 0x2ab   :  { %v3174_v33 = vld [vmem:[#allocation7 + $0x2] ss:$0 sm:$0xff] }
 0x2ac   :  { %v1927_v24 = vpop.f32.mrf.mxu3  ;;  %v2256_v8 = vpop.f32.mrf.mxu1 }
 0x2ad   :  { %v1822_v47 = vpop.f32.mrf.mxu2  ;;  %v2028_v19 = vpop.f32.mrf.mxu0 }
 0x2ae   :  { %v1823_v27 = vadd.f32 %v1822_v47, %v4893_v3 }
 0x2af   :  { %3093 = vmatmul.msk.f32.gmra.mxu1 %vm5741_vm1, %v5602_v17 }
 0x2b0   :  { %v1924_v51 = vadd.f32 %v1923_v39, %v1823_v27  ;;  %3074 = vmatmul.msk.f32.vlgmr.msra.gmra.mxu0 %vm5735_vm0, %v5602_v17  ;;  %v5781_v39 = vld [vmem:[#allocation75_spill] sm:$0xff]  ;;  %vm5811_vm0 = vnez %v5758_v38 }
 0x2b1   :  { %2504 = vmatmul.f32.gmra.mxu3 %v5779_v42  ;;  %v2851_v5 = vadd.f32 %v3173_v2, %v5781_v39  ;;  %v5788_v39 = vld [vmem:[#allocation67_spill] sm:$0xff] }
 0x2b2   :  { %v5076_v40 = vadd.f32 %v2850_v36, %v1924_v51  ;;  %2376 = vmatmul.f32.gmra.mxu2 %v5780_v25  ;;  %v5786_v51 = vld [vmem:[#allocation50_spill] sm:$0xff] }
 0x2b4   :  { %v1931_v4 = vpop.f32.mrf.mxu3  ;;  %v5079_v1 = vpop.f32.mrf.mxu1 }
 0x2b5   :  { %v1826_v3 = vpop.f32.mrf.mxu2  ;;  %v2035_v56 = vpop.f32.mrf.mxu0 }
 0x2b6   :  { %v1827_v35 = vadd.f32 %v1826_v3, %v4905_v52 }
 0x2b7   :  { %3094 = vmatmul.msk.f32.gmra.mxu1 %vm3748_vm6, %v5602_v17 }
 0x2b8   :  { %v1928_v26 = vadd.f32 %v1927_v24, %v1827_v35  ;;  %3075 = vmatmul.msk.f32.gmra.mxu0 %vm5741_vm1, %v5602_v17  ;;  %v2852_v24 = vadd.f32 %v3174_v33, %v5784_v32  ;;  %vm5813_vm1 = vnez %v5558_v45 }
 0x2b9   :  { %2510 = vmatmul.f32.gmra.mxu3 %v5782_v13  ;;  %v3175_v13 = vld [vmem:[#allocation7 + $0x3] ss:$0 sm:$0xff] }
 0x2ba   :  { %v5090_v21 = vadd.f32 %v2851_v5, %v1928_v26  ;;  %2380 = vmatmul.f32.gmra.mxu2 %v5783_v60  ;;  %v5789_v26 = vld [vmem:[#allocation60_spill] sm:$0xff] }
 0x2bc   :  { %v1935_v8 = vpop.f32.mrf.mxu3  ;;  %v5093_v52 = vpop.f32.mrf.mxu1 }
 0x2bd   :  { %v1830_v47 = vpop.f32.mrf.mxu2  ;;  %v5095_v19 = vpop.f32.mrf.mxu0 }
 0x2be   :  { %v1831_v2 = vadd.f32 %v1830_v47, %v4917_v48  ;;  %v2260_v28 = vadd.f32 %v5079_v1, %v5095_v19 }
 0x2bf   :  { %3095 = vmatmul.msk.f32.gmra.mxu1 %vm3766_vm8, %v5602_v17 }
 0x2c0   :  { %v1932_v27 = vadd.f32 %v1931_v4, %v1831_v2  ;;  %3076 = vmatmul.msk.f32.gmra.mxu0 %vm3748_vm6, %v5602_v17  ;;  %v2853_v4 = vadd.f32 %v3174_v33, %v5787_v63 }
 0x2c1   :  { %2516 = vmatmul.f32.gmra.mxu3 %v5785_v54  ;;  %v5792_v54 = vld [vmem:[#allocation66_spill] sm:$0xff] }
 0x2c2   :  { %v5106_v36 = vadd.f32 %v2852_v24, %v1932_v27  ;;  %2385 = vmatmul.f32.gmra.mxu2 %v5786_v51  ;;  %v5791_v24 = vld [vmem:[#allocation70_spill] sm:$0xff] }
 0x2c4   :  { %v1939_v42 = vpop.f32.mrf.mxu3  ;;  %v5109_v25 = vpop.f32.mrf.mxu1 }
 0x2c5   :  { %v1834_v48 = vpop.f32.mrf.mxu2  ;;  %v5111_v3 = vpop.f32.mrf.mxu0 }
 0x2c6   :  { %v1835_v56 = vadd.f32 %v1834_v48, %v4929_v22  ;;  %v2264_v37 = vadd.f32 %v5093_v52, %v5111_v3 }
 0x2c7   :  { %3096 = vmatmul.msk.f32.gmra.mxu1 %vm3789_vm9, %v5602_v17 }
 0x2c8   :  { %v1936_v35 = vadd.f32 %v1935_v8, %v1835_v56  ;;  %3077 = vmatmul.msk.f32.gmra.mxu0 %vm3766_vm8, %v5602_v17  ;;  %v2854_v8 = vadd.f32 %v3175_v13, %v5790_v23 }
 0x2c9   :  { %2522 = vmatmul.f32.gmra.mxu3 %v5788_v39 }
 0x2ca   :  { %v5122_v5 = vadd.f32 %v2853_v4, %v1936_v35  ;;  %2390 = vmatmul.f32.gmra.mxu2 %v5789_v26  ;;  %v5794_v35 = vld [vmem:[#allocation18_spill] sm:$0xff]  ;;  %v5795_v26 = vld [vmem:[#allocation68_spill] sm:$0xff] }
 0x2cc   :  { %v1943_v60 = vpop.f32.mrf.mxu3  ;;  %v5125_v22 = vpop.f32.mrf.mxu1 }
 0x2cd   :  { %v1838_v47 = vpop.f32.mrf.mxu2  ;;  %v5127_v2 = vpop.f32.mrf.mxu0 }
 0x2ce   :  { %v1839_v33 = vadd.f32 %v1838_v47, %v4941_v30  ;;  %v3176_v47 = vld [vmem:[#allocation7 + $0x4] ss:$0 sm:$0xff] }
 0x2cf   :  { %3097 = vmatmul.msk.f32.gmra.mxu1 %vm3835_vm11, %v5602_v17 }
 0x2d0   :  { %v1940_v32 = vadd.f32 %v1939_v42, %v1839_v33  ;;  %3078 = vmatmul.msk.f32.gmra.mxu0 %vm3789_vm9, %v5602_v17  ;;  %v2855_v42 = vadd.f32 %v3175_v13, %v5793_v50 }
 0x2d1   :  { %2528 = vmatmul.f32.gmra.mxu3 %v5791_v24  ;;  %v5797_v24 = vld [vmem:[#allocation26_spill] sm:$0xff] }
 0x2d2   :  { %v5138_v27 = vadd.f32 %v2854_v8, %v1940_v32  ;;  %2395 = vmatmul.f32.gmra.mxu2 %v5792_v54 }
 0x2d4   :  { %v1947_v51 = vpop.f32.mrf.mxu3  ;;  %v5141_v48 = vpop.f32.mrf.mxu1 }
 0x2d5   :  { %v1842_v30 = vpop.f32.mrf.mxu2  ;;  %v5143_v56 = vpop.f32.mrf.mxu0 }
 0x2d6   :  { %v1843_v63 = vadd.f32 %v1842_v30, %v4953_v49  ;;  %v5798_v30 = vld [vmem:[#allocation16_spill] sm:$0xff]  ;;  %v2272_v52 = vadd.f32 %v5125_v22, %v5143_v56 }
 0x2d7   :  { %3098 = vmatmul.msk.f32.gmra.mxu1 %vm3944_vm15, %v5602_v17 }
 0x2d8   :  { %v1944_v4 = vadd.f32 %v1943_v60, %v1843_v63  ;;  %3079 = vmatmul.msk.f32.gmra.mxu0 %vm3835_vm11, %v5602_v17  ;;  %v2856_v60 = vadd.f32 %v3176_v47, %v5796_v59  ;;  %v3177_v59 = vld [vmem:[#allocation7 + $0x5] ss:$0 sm:$0xff] }
 0x2d9   :  { %2534 = vmatmul.f32.gmra.mxu3 %v5794_v35 }
 0x2da   :  { %v5154_v39 = vadd.f32 %v2855_v42, %v1944_v4  ;;  %2400 = vmatmul.f32.gmra.mxu2 %v5795_v26  ;;  %v5800_v26 = vld [vmem:[#allocation30_spill] sm:$0xff] }
 0x2dc   :  { %v1951_v33 = vpop.f32.mrf.mxu3  ;;  %v5157_v49 = vpop.f32.mrf.mxu1 }
 0x2dd   :  { %v1846_v23 = vpop.f32.mrf.mxu2  ;;  %v5159_v8 = vpop.f32.mrf.mxu0 }
 0x2de   :  { %v1847_v13 = vadd.f32 %v1846_v23, %v4965_v6 }
 0x2df   :  { %3099 = vmatmul.msk.f32.gmra.mxu1 %vm3999_vm12, %v5602_v17 }
 0x2e0   :  { %v1948_v32 = vadd.f32 %v1947_v51, %v1847_v13  ;;  %3080 = vmatmul.msk.f32.gmra.mxu0 %vm3944_vm15, %v5602_v17  ;;  %v2857_v51 = vadd.f32 %v3176_v47, %v5799_v11  ;;  %v5802_v13 = vld [vmem:[#allocation25_spill] sm:$0xff]  ;;  %v5806_v11 = vld [vmem:[#allocation27_spill] sm:$0xff] }
 0x2e1   :  { %2540 = vmatmul.f32.gmra.mxu3 %v5797_v24 }
 0x2e2   :  { %v5170_v54 = vadd.f32 %v2856_v60, %v1948_v32  ;;  %2405 = vmatmul.f32.gmra.mxu2 %v5798_v30 }
 0x2e4   :  { %v1955_v63 = vpop.f32.mrf.mxu3  ;;  %v5173_v50 = vpop.f32.mrf.mxu1 }
 0x2e5   :  { %v1850_v6 = vpop.f32.mrf.mxu2  ;;  %v5175_v42 = vpop.f32.mrf.mxu0 }
 0x2e6   :  { %v1851_v4 = vadd.f32 %v1850_v6, %v4977_v7  ;;  %v5804_v6 = vld [vmem:[#allocation36_spill] sm:$0xff] }
 0x2e7   :  { %3100 = vmatmul.msk.f32.gmra.mxu1 %vm3992_vm14, %v5602_v17 }
 0x2e8   :  { %v1952_v35 = vadd.f32 %v1951_v33, %v1851_v4  ;;  %3081 = vmatmul.msk.f32.gmra.mxu0 %vm3999_vm12, %v5602_v17  ;;  %v2858_v33 = vadd.f32 %v3177_v59, %v5803_v41 }
 0x2e9   :  { %2546 = vmatmul.f32.gmra.mxu3 %v5800_v26 }
 0x2ea   :  { %v5186_v23 = vadd.f32 %v2857_v51, %v1952_v35  ;;  %2410 = vmatmul.f32.gmra.mxu2 %v5802_v13 }
 0x2ec   :  { %5801 = vst [vmem:[#allocation74_spill] sm:$0xff] %v5186_v23  ;;  %v1959_v60 = vpop.f32.mrf.mxu3  ;;  %v5189_v7 = vpop.f32.mrf.mxu1 }
 0x2ed   :  { %v1854_v32 = vpop.f32.mrf.mxu2  ;;  %v5191_v24 = vpop.f32.mrf.mxu0 }
 0x2ee   :  { %v1855_v47 = vadd.f32 %v1854_v32, %v4989_v9 }
 0x2ef   :  { %3101 = vmatmul.msk.f32.gmra.mxu1 %vm3649_vm2, %v5602_v17 }
 0x2f0   :  { %v1956_v30 = vadd.f32 %v1955_v63, %v1855_v47  ;;  %3082 = vmatmul.msk.f32.gmra.mxu0 %vm3992_vm14, %v5602_v17  ;;  %v5807_v63 = vld [vmem:[#allocation38_spill] sm:$0xff]  ;;  %v5808_v47 = vld [vmem:[#allocation44_spill] sm:$0xff] }
 0x2f1   :  { %2552 = vmatmul.f32.gmra.mxu3 %v5804_v6  ;;  %v2859_v43 = vadd.f32 %v3177_v59, %v5807_v63 }
 0x2f2   :  { %v5202_v4 = vadd.f32 %v2858_v33, %v1956_v30  ;;  %2415 = vmatmul.f32.gmra.mxu2 %v5806_v11  ;;  %v5809_v33 = vld [vmem:[#allocation31_spill] sm:$0xff]  ;;  %v3178_v30 = vld [vmem:[#allocation7 + $0x6] ss:$0 sm:$0xff] }
 0x2f3   :  { %v2860_v59 = vadd.f32 %v3178_v30, %v5810_v10 }
 0x2f4   :  { %5805 = vst [vmem:[#allocation76_spill] sm:$0xff] %v5202_v4  ;;  %v1963_v51 = vpop.f32.mrf.mxu3  ;;  %v2291_v35 = vpop.f32.mrf.mxu1 }
 0x2f5   :  { %v1858_v9 = vpop.f32.mrf.mxu2  ;;  %v5205_v26 = vpop.f32.mrf.mxu0 }
 0x2f6   :  { %v1859_v13 = vadd.f32 %v1858_v9, %v5001_v14 }
 0x2f7   :  { %3102 = vmatmul.msk.f32.gmra.mxu1 %vm3703_vm4, %v5602_v17 }
 0x2f8   :  { %v1960_v32 = vadd.f32 %v1959_v60, %v1859_v13  ;;  %3083 = vmatmul.msk.f32.gmra.mxu0 %vm3649_vm2, %v5602_v17 }
 0x2f9   :  { %2558 = vmatmul.f32.gmra.mxu3 %v5808_v47 }
 0x2fa   :  { %v5216_v41 = vadd.f32 %v2859_v43, %v1960_v32  ;;  %2420 = vmatmul.f32.gmra.mxu2 %v5809_v33 }
 0x2fc   :  { %v1967_v6 = vpop.f32.mrf.mxu3  ;;  %v2295_v14 = vpop.f32.mrf.mxu1 }
 0x2fd   :  { %v1862_v11 = vpop.f32.mrf.mxu2  ;;  %v2106_v9 = vpop.f32.mrf.mxu0 }
 0x2fe   :  { %v1863_v4 = vadd.f32 %v1862_v11, %v5013_v29  ;;  %v5220_v23 = vadd.f32 %v2291_v35, %v2106_v9 }
 0x2ff   :  { %3103 = vmatmul.msk.f32.gmra.mxu1 %vm3696_vm3, %v5602_v17 }
 0x300   :  { %v1964_v60 = vadd.f32 %v1963_v51, %v1863_v4  ;;  %3084 = vmatmul.msk.f32.gmra.mxu0 %vm3703_vm4, %v5602_v17  ;;  %v2861_v4 = vadd.f32 %v3178_v30, %v5812_v20 }
 0x301   :  { %2564 = vmatmul.f32.gmra.mxu3 %v3860_v12 }
 0x302   :  { %v5230_v13 = vadd.f32 %v2860_v59, %v1964_v60  ;;  %2425 = vmatmul.f32.gmra.mxu2 %v3802_v61 }
 0x304   :  { %v1971_v29 = vpop.f32.mrf.mxu3  ;;  %v2299_v35 = vpop.f32.mrf.mxu1 }
 0x305   :  { %v1866_v63 = vpop.f32.mrf.mxu2  ;;  %v2114_v43 = vpop.f32.mrf.mxu0 }
 0x306   :  { %v1867_v32 = vadd.f32 %v1866_v63, %v5025_v44  ;;  %v5234_v47 = vadd.f32 %v2295_v14, %v2114_v43 }
 0x307   :  { %3104 = vmatmul.msk.f32.gmra.mxu1 %vm5811_vm0, %v5602_v17 }
 0x308   :  { %v1968_v51 = vadd.f32 %v1967_v6, %v1867_v32  ;;  %3085 = vmatmul.msk.f32.gmra.mxu0 %vm3696_vm3, %v5602_v17 }
 0x309   :  { %2570 = vmatmul.f32.gmra.mxu3 %v3906_v18 }
 0x30a   :  { %v5244_v61 = vadd.f32 %v2861_v4, %v1968_v51  ;;  %2430 = vmatmul.f32.gmra.mxu2 %v3846_v55 }
 0x30c   :  { %v1974_v12 = vpop.f32.mrf.mxu3  ;;  %v2303_v44 = vpop.f32.mrf.mxu1 }
 0x30d   :  { %v1870_v33 = vpop.f32.mrf.mxu2  ;;  %v2122_v14 = vpop.f32.mrf.mxu0 }
 0x30e   :  { %v5247_v11 = vadd.f32 %v2299_v35, %v2122_v14 }
 0x30f   :  { %3105 = vmatmul.msk.f32.gmra.mxu1 %vm5813_vm1, %v5602_v17 }
 0x310   :  { %3086 = vmatmul.msk.f32.gmra.mxu0 %vm5811_vm0, %v5602_v17 }
 0x311   :  { %2576 = vmatmul.f32.gmra.mxu3 %v3920_v46 }
 0x312   :  { %2435 = vmatmul.f32.gmra.mxu2 %v3897_v16 }
 0x314   :  { %v2307_v18 = vpop.f32.mrf.mxu1  ;;  %v2485_v55 = vpop.f32.mrf.mxu3 }
 0x315   :  { %v1873_v53 = vpop.f32.mrf.mxu2  ;;  %v2130_v30 = vpop.f32.mrf.mxu0 }
 0x316   :  { %v5257_v6 = vadd.f32 %v2303_v44, %v2130_v30 }
 0x317   :  { %3106 = vmatmul.msk.f32.gmra.mxu1 %vm3808_vm10, %v5602_v17 }
 0x318   :  { %3087 = vmatmul.msk.f32.gmra.mxu0 %vm5813_vm1, %v5602_v17 }
 0x319   :  { %2582 = vmatmul.f32.gmra.mxu3 %v3960_v57 }
 0x31a   :  { %2440 = vmatmul.f32.gmra.mxu2 %v3908_v31 }
 0x31c   :  { %v2311_v46 = vpop.f32.mrf.mxu1  ;;  %v2490_v16 = vpop.f32.mrf.mxu3 }
 0x31d   :  { %v2138_v38 = vpop.f32.mrf.mxu0  ;;  %v2365_v9 = vpop.f32.mrf.mxu2 }
 0x31e   :  { %v5267_v10 = vadd.f32 %v2307_v18, %v2138_v38 }
 0x31f   :  { %3107 = vmatmul.msk.f32.gmra.mxu1 %vm3881_vm13, %v5602_v17 }
 0x320   :  { %3088 = vmatmul.msk.f32.gmra.mxu0 %vm3808_vm10, %v5602_v17 }
 0x322   :  { %2445 = vmatmul.f32.gmra.mxu2 %v3936_v58 }
 0x324   :  { %v2495_v45 = vpop.f32.mrf.mxu3  ;;  %v2753_v57 = vpop.f32.mrf.mxu1 }
 0x325   :  { %v2146_v59 = vpop.f32.mrf.mxu0  ;;  %v2369_v31 = vpop.f32.mrf.mxu2 }
 0x326   :  { %v5276_v60 = vadd.f32 %v2311_v46, %v2146_v59 }
 0x327   :  { %3108 = vmatmul.msk.f32.gmra.mxu1 %vm5765_vm5, %v5602_v17 }
 0x328   :  { %3089 = vmatmul.msk.f32.gmra.mxu0 %vm3881_vm13, %v5602_v17 }
 0x32c   :  { %v2500_v29 = vpop.f32.mrf.mxu3  ;;  %v2756_v35 = vpop.f32.mrf.mxu1 }
 0x32d   :  { %v2373_v34 = vpop.f32.mrf.mxu2  ;;  %v2652_v63 = vpop.f32.mrf.mxu0 }
 0x32f   :  { %3109 = vmatmul.msk.f32.gmra.mxu1 %vm5767_vm7, %v5602_v17 }
 0x330   :  { %3090 = vmatmul.msk.f32.gmra.mxu0 %vm5765_vm5, %v5602_v17 }
 0x334   :  { %v2505_v58 = vpop.f32.mrf.mxu3  ;;  %v2759_v43 = vpop.f32.mrf.mxu1 }
 0x335   :  { %v2377_v32 = vpop.f32.mrf.mxu2  ;;  %v2655_v20 = vpop.f32.mrf.mxu0 }
 0x338   :  { %3091 = vmatmul.msk.f32.gmra.mxu0 %vm5767_vm7, %v5602_v17  ;;  %v2268_v17 = vadd.f32 %v5109_v25, %v5127_v2 }
 0x33c   :  { %v2511_v4 = vpop.f32.mrf.mxu3  ;;  %v2762_v51 = vpop.f32.mrf.mxu1 }
 0x33d   :  { %v2381_v12 = vpop.f32.mrf.mxu2  ;;  %v2658_v44 = vpop.f32.mrf.mxu0 }
 0x33e   :  { %v2382_v33 = vadd.f32 %v2381_v12, %v2260_v28 }
 0x340   :  { %v2506_v14 = vadd.f32 %v2505_v58, %v2382_v33  ;;  %v2276_v33 = vadd.f32 %v5141_v48, %v5159_v8 }
 0x344   :  { %v2517_v18 = vpop.f32.mrf.mxu3  ;;  %v2765_v55 = vpop.f32.mrf.mxu1 }
 0x345   :  { %v2386_v53 = vpop.f32.mrf.mxu2  ;;  %v2661_v30 = vpop.f32.mrf.mxu0 }
 0x346   :  { %v2387_v46 = vadd.f32 %v2386_v53, %v2264_v37 }
 0x348   :  { %v2512_v16 = vadd.f32 %v2511_v4, %v2387_v46 }
 0x34c   :  { %v2769_v0 = vpop.f32.mrf.mxu1  ;;  %v2523_v38 = vpop.f32.mrf.mxu3 }
 0x34d   :  { %v2391_v1 = vpop.f32.mrf.mxu2  ;;  %v2664_v19 = vpop.f32.mrf.mxu0 }
 0x34e   :  { %v2392_v9 = vadd.f32 %v2391_v1, %v2268_v17  ;;  %v2665_v45 = vadd.f32 %v2664_v19, %v2506_v14 }
 0x350   :  { %v2766_v57 = vadd.f32 %v2765_v55, %v2665_v45  ;;  %v2518_v59 = vadd.f32 %v2517_v18, %v2392_v9  ;;  %v2284_v45 = vadd.f32 %v5173_v50, %v5191_v24 }
 0x352   :  { %v5300_v31 = vadd.f32 %v5054_v62, %v2766_v57 }
 0x354   :  { %v2773_v3 = vpop.f32.mrf.mxu1  ;;  %v2529_v25 = vpop.f32.mrf.mxu3 }
 0x355   :  { %v2396_v29 = vpop.f32.mrf.mxu2  ;;  %v2668_v35 = vpop.f32.mrf.mxu0 }
 0x356   :  { %v2397_v34 = vadd.f32 %v2396_v29, %v2272_v52  ;;  %v2669_v63 = vadd.f32 %v2668_v35, %v2512_v16 }
 0x358   :  { %v2770_v2 = vadd.f32 %v2769_v0, %v2669_v63  ;;  %v2524_v58 = vadd.f32 %v2523_v38, %v2397_v34 }
 0x35a   :  { %v5305_v43 = vadd.f32 %v5064_v15, %v2770_v2 }
 0x35c   :  { %v2777_v32 = vpop.f32.mrf.mxu1  ;;  %v2535_v51 = vpop.f32.mrf.mxu3 }
 0x35d   :  { %v2401_v20 = vpop.f32.mrf.mxu2  ;;  %v2672_v28 = vpop.f32.mrf.mxu0 }
 0x35e   :  { %v2673_v4 = vadd.f32 %v2672_v28, %v2518_v59  ;;  %v2402_v37 = vadd.f32 %v2401_v20, %v2276_v33 }
 0x360   :  { %v2774_v62 = vadd.f32 %v2773_v3, %v2673_v4  ;;  %v2530_v30 = vadd.f32 %v2529_v25, %v2402_v37 }
 0x362   :  { %v5308_v12 = vadd.f32 %v5076_v40, %v2774_v62  ;;  %v2280_v40 = vadd.f32 %v5157_v49, %v5175_v42 }
 0x364   :  { %v2781_v22 = vpop.f32.mrf.mxu1  ;;  %v2541_v55 = vpop.f32.mrf.mxu3 }
 0x365   :  { %v2406_v56 = vpop.f32.mrf.mxu2  ;;  %v2676_v44 = vpop.f32.mrf.mxu0 }
 0x366   :  { %v2677_v14 = vadd.f32 %v2676_v44, %v2524_v58  ;;  %v2407_v0 = vadd.f32 %v2406_v56, %v2280_v40  ;;  %v5814_v40 = vld [vmem:[#allocation74_spill] sm:$0xff] }
 0x368   :  { %v2778_v18 = vadd.f32 %v2777_v32, %v2677_v14  ;;  %v2536_v38 = vadd.f32 %v2535_v51, %v2407_v0 }
 0x36a   :  { %v5313_v15 = vadd.f32 %v5090_v21, %v2778_v18 }
 0x36c   :  { %v2785_v53 = vpop.f32.mrf.mxu1  ;;  %v2547_v59 = vpop.f32.mrf.mxu3 }
 0x36d   :  { %v2411_v46 = vpop.f32.mrf.mxu2  ;;  %v2680_v16 = vpop.f32.mrf.mxu0 }
 0x36e   :  { %v2681_v17 = vadd.f32 %v2680_v16, %v2530_v30  ;;  %v2412_v52 = vadd.f32 %v2411_v46, %v2284_v45 }
 0x370   :  { %v2782_v1 = vadd.f32 %v2781_v22, %v2681_v17  ;;  %v2542_v35 = vadd.f32 %v2541_v55, %v2412_v52 }
 0x372   :  { %v2880_v19 = vadd.f32 %v5106_v36, %v2782_v1 }
 0x374   :  { %v2890_v48 = vmax.f32 %v5300_v31, %v2880_v19  ;;  %v2789_v8 = vpop.f32.mrf.mxu1  ;;  %v2288_v31 = vadd.f32 %v5189_v7, %v5205_v26  ;;  %v2553_v58 = vpop.f32.mrf.mxu3 }
 0x375   :  { %v2416_v9 = vpop.f32.mrf.mxu2  ;;  %v2684_v21 = vpop.f32.mrf.mxu0 }
 0x376   :  { %v2685_v57 = vadd.f32 %v2684_v21, %v2536_v38  ;;  %v2417_v25 = vadd.f32 %v2416_v9, %v2288_v31  ;;  %v5815_v9 = vld [vmem:[#allocation76_spill] sm:$0xff] }
 0x378   :  { %v2786_v3 = vadd.f32 %v2785_v53, %v2685_v57  ;;  %v2548_v20 = vadd.f32 %v2547_v59, %v2417_v25 }
 0x37a   :  { %v2881_v49 = vadd.f32 %v5122_v5, %v2786_v3 }
 0x37c   :  { %v2896_v42 = vmax.f32 %v5305_v43, %v2881_v49  ;;  %v2793_v29 = vpop.f32.mrf.mxu1  ;;  %v2559_v22 = vpop.f32.mrf.mxu3 }
 0x37d   :  { %v2421_v36 = vpop.f32.mrf.mxu2  ;;  %v2688_v34 = vpop.f32.mrf.mxu0 }
 0x37e   :  { %v2689_v63 = vadd.f32 %v2688_v34, %v2542_v35  ;;  %v2422_v4 = vadd.f32 %v2421_v36, %v5220_v23 }
 0x380   :  { %v2790_v2 = vadd.f32 %v2789_v8, %v2689_v63  ;;  %v2554_v26 = vadd.f32 %v2553_v58, %v2422_v4 }
 0x382   :  { %v2882_v50 = vadd.f32 %v5138_v27, %v2790_v2 }
 0x384   :  { %v2891_v24 = vmax.f32 %v5308_v12, %v2882_v50  ;;  %v2797_v32 = vpop.f32.mrf.mxu1  ;;  %v2565_v53 = vpop.f32.mrf.mxu3 }
 0x385   :  { %v2426_v5 = vpop.f32.mrf.mxu2  ;;  %v2692_v28 = vpop.f32.mrf.mxu0 }
 0x386   :  { %v2693_v43 = vadd.f32 %v2692_v28, %v2548_v20  ;;  %v2427_v12 = vadd.f32 %v2426_v5, %v5234_v47 }
 0x388   :  { %v2794_v62 = vadd.f32 %v2793_v29, %v2693_v43  ;;  %v2560_v55 = vadd.f32 %v2559_v22, %v2427_v12 }
 0x38a   :  { %v2883_v51 = vadd.f32 %v5154_v39, %v2794_v62 }
 0x38c   :  { %v2897_v7 = vmax.f32 %v5313_v15, %v2883_v51  ;;  %v2801_v44 = vpop.f32.mrf.mxu1  ;;  %v2571_v47 = vpop.f32.mrf.mxu3 }
 0x38d   :  { %v2696_v56 = vpop.f32.mrf.mxu0  ;;  %v2431_v27 = vpop.f32.mrf.mxu2 }
 0x38e   :  { %v2697_v33 = vadd.f32 %v2696_v56, %v2554_v26  ;;  %v2432_v39 = vadd.f32 %v2431_v27, %v5247_v11 }
 0x390   :  { %v2798_v14 = vadd.f32 %v2797_v32, %v2697_v33  ;;  %v2566_v1 = vadd.f32 %v2565_v53, %v2432_v39 }
 0x392   :  { %v2884_v37 = vadd.f32 %v5170_v54, %v2798_v14 }
 0x394   :  { %v2892_v18 = vmax.f32 %v2890_v48, %v2884_v37  ;;  %v2805_v46 = vpop.f32.mrf.mxu1  ;;  %v2577_v29 = vpop.f32.mrf.mxu3 }
 0x395   :  { %v2700_v23 = vpop.f32.mrf.mxu0  ;;  %v2436_v15 = vpop.f32.mrf.mxu2 }
 0x396   :  { %v2701_v30 = vadd.f32 %v2700_v23, %v2560_v55  ;;  %v2437_v38 = vadd.f32 %v2436_v15, %v5257_v6 }
 0x398   :  { %v2802_v16 = vadd.f32 %v2801_v44, %v2701_v30  ;;  %v2572_v59 = vadd.f32 %v2571_v47, %v2437_v38 }
 0x39a   :  { %v2885_v17 = vadd.f32 %v5814_v40, %v2802_v16 }
 0x39c   :  { %v2898_v0 = vmax.f32 %v2896_v42, %v2885_v17  ;;  %v2809_v48 = vpop.f32.mrf.mxu1  ;;  %v2583_v50 = vpop.f32.mrf.mxu3 }
 0x39d   :  { %v2704_v19 = vpop.f32.mrf.mxu0  ;;  %v2441_v45 = vpop.f32.mrf.mxu2 }
 0x39e   :  { %v2705_v8 = vadd.f32 %v2704_v19, %v2566_v1  ;;  %v2442_v3 = vadd.f32 %v2441_v45, %v5267_v10  ;;  %v3179_v10 = vld [vmem:[%s5353_s3] ss:$0 sm:$0xff] }
 0x3a0   :  { %v2806_v54 = vadd.f32 %v2805_v46, %v2705_v8  ;;  %v2578_v34 = vadd.f32 %v2577_v29, %v2442_v3 }
 0x3a2   :  { %v2886_v21 = vadd.f32 %v5815_v9, %v2806_v54 }
 0x3a4   :  { %v2893_v57 = vmax.f32 %v2891_v24, %v2886_v21  ;;  %v2813_v35 = vpop.f32.mrf.mxu1 }
 0x3a5   :  { %v2708_v11 = vpop.f32.mrf.mxu0  ;;  %v2446_v31 = vpop.f32.mrf.mxu2 }
 0x3a6   :  { %v2709_v52 = vadd.f32 %v2708_v11, %v2572_v59  ;;  %v2447_v25 = vadd.f32 %v2446_v31, %v5276_v60 }
 0x3a8   :  { %v2810_v49 = vadd.f32 %v2809_v48, %v2709_v52  ;;  %v2584_v32 = vadd.f32 %v2583_v50, %v2447_v25 }
 0x3aa   :  { %v2887_v42 = vadd.f32 %v5216_v41, %v2810_v49 }
 0x3ac   :  { %v2899_v36 = vmax.f32 %v2897_v7, %v2887_v42  ;;  %v2817_v28 = vpop.f32.mrf.mxu1 }
 0x3ad   :  { %v2712_v6 = vpop.f32.mrf.mxu0 }
 0x3ae   :  { %v2713_v63 = vadd.f32 %v2712_v6, %v2578_v34 }
 0x3b0   :  { %v2814_v2 = vadd.f32 %v2813_v35, %v2713_v63 }
 0x3b2   :  { %v2888_v58 = vadd.f32 %v5230_v13, %v2814_v2 }
 0x3b4   :  { %v2894_v24 = vmax.f32 %v2892_v18, %v2888_v58 }
 0x3b5   :  { %v2716_v20 = vpop.f32.mrf.mxu0 }
 0x3b6   :  { %v2895_v41 = vmax.f32 %v2894_v24, %v2893_v57  ;;  %v2717_v5 = vadd.f32 %v2716_v20, %v2584_v32 }
 0x3b8   :  { %v2818_v43 = vadd.f32 %v2817_v28, %v2717_v5  ;;  %v2906_v4 = vadd.f32 %v3179_v10, %v2895_v41 }
 0x3ba   :  { %v2889_v62 = vadd.f32 %v5244_v61, %v2818_v43  ;;  %2908 = vst [vmem:[#allocation8] sm:$0xff] %v2906_v4 }
 0x3bc   :  { %v2900_v60 = vmax.f32 %v2898_v0, %v2889_v62 }
 0x3be   :  { %v2901_v13 = vmax.f32 %v2900_v60, %v2899_v36 }
 0x3c0   :  { %v2907_v51 = vadd.f32 %v3179_v10, %v2901_v13 }
 0x3c2   :  { %2909 = vst [vmem:[#allocation8 + $0x8] sm:$0xff] %v2907_v51 }
 0x3c3   :  { %2922 = dma.vmem_to_hbm [thread:$0]  %s2915_s10, 256, %s2917_s13, [#allocation4], %s3286_s27, %s3286_s27, %s3287_s28  }
 0x3c4   :  { %3280 = dma.done.wait [#allocation4], 256  }
 0x3c5   :  { %3281 = vsyncadd [#allocation4], 4294967040 }
 0x3c6   :  { %2927 = vsyncpa [#allocation3], 1 }
 0x3c7   :  { %2928 = vsyncpa [#allocation6], 1 }
 0x3c8   :  { %2929 = vsyncpa [#allocation4], 1 }

</bundles_post_ra>
